<compile_context>
chip_gen: v6e
topology: v6e:2x2x1
jax: 0.10.0
libtpu: 0.0.40
codegen_flags: <defaults>
</compile_context>

<pallas_src>
import functools

import jax
import jax.numpy as jnp
from jax.experimental import pallas as pl
from jax.experimental.pallas import tpu as pltpu

LANE = 128      # lane width: feature / classifier dims padded to multiples of this
SUBLANE = 8     # sublane width: batch tiles kept a multiple of this


def _round_up(n, m):
    return ((n + m - 1) // m) * m


def _use_bf16_tanh():
    """bf16 tanh only where the EUP has a bf16 path (v6e / v7x); f32 elsewhere."""
    try:
        kind = jax.devices()[0].device_kind.lower()
    except Exception:
        return False
    if not kind or any(old in kind for old in ("v2", "v3", "v4", "v5")):
        return False
    return "tpu" in kind


def _fused_mlp_kernel(x_ref,
                      w1_ref, b1_ref,
                      w2_ref, b2_ref,
                      w3_ref, b3_ref,
                      w4_ref, b4_ref,
                      w5_ref, b5_ref,
                      o_ref, *, tanh_dtype):
    """Fused 5-layer MLP: tanh(x@W1+b1) -> ... -> tanh(.@W4+b4) -> .@W5+b5.

    x_ref is already bf16; weights bf16, biases f32. Matmuls accumulate in f32 on the
    MXU, bias-add in f32 on the VPU, tanh on the EUP in `tanh_dtype` (bf16 on v6e/v7x).
    """

    def hidden_layer(h_bf16, w_ref, b_ref):
        acc = jnp.dot(h_bf16, w_ref[...], preferred_element_type=jnp.float32)
        acc = acc + b_ref[...]
        if tanh_dtype == jnp.bfloat16:
            return jnp.tanh(acc.astype(jnp.bfloat16))   # bf16 EUP, feeds next MXU directly
        return jnp.tanh(acc).astype(jnp.bfloat16)       # f32 EUP path (v5e and older)

    h = x_ref[...]
    h = hidden_layer(h, w1_ref, b1_ref)
    h = hidden_layer(h, w2_ref, b2_ref)
    h = hidden_layer(h, w3_ref, b3_ref)
    h = hidden_layer(h, w4_ref, b4_ref)
    out = jnp.dot(h, w5_ref[...], preferred_element_type=jnp.float32) + b5_ref[...]
    o_ref[...] = out.astype(o_ref.dtype)


def init_params(key, num_features, num_classes):
    """PyTorch-style nn.Linear init (uniform +/- 1/sqrt(fan_in)), weights as (in, out)."""
    dims = [num_features, 1024, 512, 256, 128, num_classes]
    params = []
    for i in range(len(dims) - 1):
        key, kw, kb = jax.random.split(key, 3)
        scale = float(dims[i]) ** -0.5
        w = jax.random.uniform(kw, (dims[i], dims[i + 1]), jnp.float32, -scale, scale)
        b = jax.random.uniform(kb, (dims[i + 1],), jnp.float32, -scale, scale)
        params.append((w, b))
    return params


def prepare_params(params, weight_dtype=jnp.bfloat16):
    """bf16 weights for the MXU, f32 (1, N) bias rows; zero-pad layer-1's input dim and
    the classifier's output dim out to lane-dense (128) widths."""
    prepped = []
    last = len(params) - 1
    for idx, (w, b) in enumerate(params):
        if idx == 0:
            k_pad = _round_up(w.shape[0], LANE)
            w = jnp.pad(w, ((0, k_pad - w.shape[0]), (0, 0)))
        if idx == last:
            n_pad = _round_up(w.shape[1], LANE)
            w = jnp.pad(w, ((0, 0), (0, n_pad - w.shape[1])))
            b = jnp.pad(b, (0, n_pad - b.shape[0]))
        prepped.append((w.astype(weight_dtype),
                        b.astype(jnp.float32).reshape(1, -1)))
    return prepped


def _pick_batch_tile(M):
    """Batch tile: one sublane-aligned tile for tiny batches; otherwise >=128 rows,
    capped at 512, sized so big batches get >=4 grid steps (keeps both v7x TCs busy
    and amortizes the ~0.35us per-step overhead)."""
    if M <= 128:
        return _round_up(max(M, 1), SUBLANE)
    tm = _round_up(pl.cdiv(M, 4), SUBLANE)
    return max(128, min(512, tm))


def model_to_attack_forward(x, prepped_params, num_classes, tanh_dtype=None):
    """Fused forward pass. x: (M, num_features) f32. Returns (M, num_classes) f32."""
    M, K = x.shape
    K_pad = prepped_params[0][0].shape[0]    # lane-padded feature width (128)
    n_out = prepped_params[-1][0].shape[1]   # lane-padded classifier width (128)
    if tanh_dtype is None:
        tanh_dtype = jnp.bfloat16 if _use_bf16_tanh() else jnp.float32

    tm = _pick_batch_tile(M)
    M_pad = _round_up(M, tm)
    grid = (M_pad // tm,)

    # bf16 LHS, zero-padded to a lane-dense feature width and a full batch tile.
    x_in = jnp.pad(x.astype(jnp.bfloat16), ((0, M_pad - M), (0, K_pad - K)))

    in_specs = [pl.BlockSpec((tm, K_pad), lambda i: (i, 0))]
    flat_args = [x_in]
    for (w, b) in prepped_params:
        # Weights/biases: one full block each, resident in VMEM across all batch tiles.
        # (Single-buffering them via pipeline_mode would save <2 MiB; not worth the risk.)
        in_specs.append(pl.BlockSpec(w.shape, lambda i: (0, 0)))
        in_specs.append(pl.BlockSpec(b.shape, lambda i: (0, 0)))
        flat_args.append(w)
        flat_args.append(b)

    cp = dict(dimension_semantics=("parallel",))
    if tm >= 512:
        # Fused f32 temporaries + double-buffered x/out blocks can pass v5e's 16 MiB
        # default scoped VMEM at big tiles; raise the limit explicitly.
        cp["vmem_limit_bytes"] = 48 * 1024 * 1024

    out_padded = pl.pallas_call(
        functools.partial(_fused_mlp_kernel, tanh_dtype=tanh_dtype),
        out_shape=jax.ShapeDtypeStruct((M_pad, n_out), jnp.float32),
        grid=grid,
        in_specs=in_specs,
        out_specs=pl.BlockSpec((tm, n_out), lambda i: (i, 0)),
        compiler_params=pltpu.CompilerParams(**cp),
    )(*flat_args)

    return out_padded[:M, :num_classes]


def _reference_forward_quantized(x, prepped_params, num_classes, tanh_dtype):
    """Pure-JAX reference applying the exact same quantization path as the kernel."""
    K = x.shape[1]
    K_pad = prepped_params[0][0].shape[0]
    h = jnp.pad(x.astype(jnp.bfloat16), ((0, 0), (0, K_pad - K)))
    last = len(prepped_params) - 1
    acc = None
    for idx, (w, b) in enumerate(prepped_params):
        acc = jnp.dot(h, w, preferred_element_type=jnp.float32) + b
        if idx < last:
            if tanh_dtype == jnp.bfloat16:
                h = jnp.tanh(acc.astype(jnp.bfloat16))
            else:
                h = jnp.tanh(acc).astype(jnp.bfloat16)
    return acc[:, :num_classes]


def _reference_forward_f32(x, params):
    """Pure-f32 reference matching the original PyTorch module exactly."""
    h = x
    for (w, b) in params[:-1]:
        h = jnp.tanh(h @ w + b)
    w, b = params[-1]
    return h @ w + b


if __name__ == "__main__":
    num_features = 32
    num_classes = 10
    batch = 8

    key = jax.random.PRNGKey(0)
    key, kx = jax.random.split(key)
    x = jax.random.normal(kx, (batch, num_features), jnp.float32)

    params = init_params(key, num_features, num_classes)
    prepped = prepare_params(params)

    tanh_dtype = jnp.bfloat16 if _use_bf16_tanh() else jnp.float32

    out = model_to_attack_forward(x, prepped, num_classes, tanh_dtype=tanh_dtype)
    out = jax.block_until_ready(out)
    assert out.shape == (batch, num_classes)

    # Check against a reference using the same bf16-weight / bf16-activation /
    # per-chip tanh-dtype path as the kernel.
    ref_q = _reference_forward_quantized(x, prepped, num_classes, tanh_dtype)
    assert jnp.allclose(out, ref_q, atol=2e-2, rtol=2e-2), \
        float(jnp.max(jnp.abs(out - ref_q)))

    # Looser sanity check vs. the full-f32 semantics of the original PyTorch module
    # (difference comes only from bf16 weight/activation quantization for the MXU/EUP).
    ref_f32 = _reference_forward_f32(x, params)
    assert jnp.allclose(out, ref_f32, atol=1e-1, rtol=1e-1), \
        float(jnp.max(jnp.abs(out - ref_f32)))

    print("KERNEL_OK")
</pallas_src>

<mosaic_0001>
module attributes {stable_mosaic.version = 11 : i64} {
  func.func @_fused_mlp_kernel(%arg0: i32, %arg1: memref<8x128xbf16, #tpu.memory_space<vmem>>, %arg2: memref<128x1024xbf16, #tpu.memory_space<vmem>>, %arg3: memref<1x1024xf32, #tpu.memory_space<vmem>>, %arg4: memref<1024x512xbf16, #tpu.memory_space<vmem>>, %arg5: memref<1x512xf32, #tpu.memory_space<vmem>>, %arg6: memref<512x256xbf16, #tpu.memory_space<vmem>>, %arg7: memref<1x256xf32, #tpu.memory_space<vmem>>, %arg8: memref<256x128xbf16, #tpu.memory_space<vmem>>, %arg9: memref<1x128xf32, #tpu.memory_space<vmem>>, %arg10: memref<128x128xbf16, #tpu.memory_space<vmem>>, %arg11: memref<1x128xf32, #tpu.memory_space<vmem>>, %arg12: memref<8x128xf32, #tpu.memory_space<vmem>>) attributes {dimension_semantics = [#tpu.dimension_semantics<parallel>], iteration_bounds = array<i64: 1>, scalar_prefetch = 0 : i64, scratch_operands = 0 : i64, tpu.core_type = #tpu.core_type<tc>, window_params = [{transform_indices = @transform_0, window_bounds = array<i64: 8, 128>}, {pipeline_mode = #tpu.pipeline_mode<synchronous>, transform_indices = @transform_1, window_bounds = array<i64: 128, 1024>}, {pipeline_mode = #tpu.pipeline_mode<synchronous>, transform_indices = @transform_2, window_bounds = array<i64: 1, 1024>}, {pipeline_mode = #tpu.pipeline_mode<synchronous>, transform_indices = @transform_3, window_bounds = array<i64: 1024, 512>}, {pipeline_mode = #tpu.pipeline_mode<synchronous>, transform_indices = @transform_4, window_bounds = array<i64: 1, 512>}, {pipeline_mode = #tpu.pipeline_mode<synchronous>, transform_indices = @transform_5, window_bounds = array<i64: 512, 256>}, {pipeline_mode = #tpu.pipeline_mode<synchronous>, transform_indices = @transform_6, window_bounds = array<i64: 1, 256>}, {pipeline_mode = #tpu.pipeline_mode<synchronous>, transform_indices = @transform_7, window_bounds = array<i64: 256, 128>}, {pipeline_mode = #tpu.pipeline_mode<synchronous>, transform_indices = @transform_8, window_bounds = array<i64: 1, 128>}, {pipeline_mode = #tpu.pipeline_mode<synchronous>, transform_indices = @transform_9, window_bounds = array<i64: 128, 128>}, {pipeline_mode = #tpu.pipeline_mode<synchronous>, transform_indices = @transform_10, window_bounds = array<i64: 1, 128>}, {transform_indices = @transform_11, window_bounds = array<i64: 8, 128>}]} {
    %c0 = arith.constant 0 : index
    %c0_0 = arith.constant 0 : index
    %0 = vector.load %arg1[%c0, %c0_0] : memref<8x128xbf16, #tpu.memory_space<vmem>>, vector<8x128xbf16>
    %c0_1 = arith.constant 0 : index
    %c0_2 = arith.constant 0 : index
    %1 = vector.load %arg2[%c0_1, %c0_2] : memref<128x1024xbf16, #tpu.memory_space<vmem>>, vector<128x1024xbf16>
    %cst = arith.constant dense<0.000000e+00> : vector<8x1024xf32>
    %2 = tpu.matmul %0, %1, %cst {dimension_numbers = #tpu.dot_dimension_numbers<[1], [0], [0], [1], [0, 0, 1, 1], [], []>} : vector<8x128xbf16>, vector<128x1024xbf16>, vector<8x1024xf32> -> vector<8x1024xf32>
    %c0_3 = arith.constant 0 : index
    %c0_4 = arith.constant 0 : index
    %3 = vector.load %arg3[%c0_3, %c0_4] : memref<1x1024xf32, #tpu.memory_space<vmem>>, vector<1x1024xf32>
    %4 = vector.broadcast %3 : vector<1x1024xf32> to vector<8x1024xf32>
    %5 = arith.addf %2, %4 : vector<8x1024xf32>
    %6 = math.tanh %5 : vector<8x1024xf32>
    %7 = arith.truncf %6 : vector<8x1024xf32> to vector<8x1024xbf16>
    %c0_5 = arith.constant 0 : index
    %c0_6 = arith.constant 0 : index
    %8 = vector.load %arg4[%c0_5, %c0_6] : memref<1024x512xbf16, #tpu.memory_space<vmem>>, vector<1024x512xbf16>
    %cst_7 = arith.constant dense<0.000000e+00> : vector<8x512xf32>
    %9 = tpu.matmul %7, %8, %cst_7 {dimension_numbers = #tpu.dot_dimension_numbers<[1], [0], [0], [1], [0, 0, 1, 1], [], []>} : vector<8x1024xbf16>, vector<1024x512xbf16>, vector<8x512xf32> -> vector<8x512xf32>
    %c0_8 = arith.constant 0 : index
    %c0_9 = arith.constant 0 : index
    %10 = vector.load %arg5[%c0_8, %c0_9] : memref<1x512xf32, #tpu.memory_space<vmem>>, vector<1x512xf32>
    %11 = vector.broadcast %10 : vector<1x512xf32> to vector<8x512xf32>
    %12 = arith.addf %9, %11 : vector<8x512xf32>
    %13 = math.tanh %12 : vector<8x512xf32>
    %14 = arith.truncf %13 : vector<8x512xf32> to vector<8x512xbf16>
    %c0_10 = arith.constant 0 : index
    %c0_11 = arith.constant 0 : index
    %15 = vector.load %arg6[%c0_10, %c0_11] : memref<512x256xbf16, #tpu.memory_space<vmem>>, vector<512x256xbf16>
    %cst_12 = arith.constant dense<0.000000e+00> : vector<8x256xf32>
    %16 = tpu.matmul %14, %15, %cst_12 {dimension_numbers = #tpu.dot_dimension_numbers<[1], [0], [0], [1], [0, 0, 1, 1], [], []>} : vector<8x512xbf16>, vector<512x256xbf16>, vector<8x256xf32> -> vector<8x256xf32>
    %c0_13 = arith.constant 0 : index
    %c0_14 = arith.constant 0 : index
    %17 = vector.load %arg7[%c0_13, %c0_14] : memref<1x256xf32, #tpu.memory_space<vmem>>, vector<1x256xf32>
    %18 = vector.broadcast %17 : vector<1x256xf32> to vector<8x256xf32>
    %19 = arith.addf %16, %18 : vector<8x256xf32>
    %20 = math.tanh %19 : vector<8x256xf32>
    %21 = arith.truncf %20 : vector<8x256xf32> to vector<8x256xbf16>
    %c0_15 = arith.constant 0 : index
    %c0_16 = arith.constant 0 : index
    %22 = vector.load %arg8[%c0_15, %c0_16] : memref<256x128xbf16, #tpu.memory_space<vmem>>, vector<256x128xbf16>
    %cst_17 = arith.constant dense<0.000000e+00> : vector<8x128xf32>
    %23 = tpu.matmul %21, %22, %cst_17 {dimension_numbers = #tpu.dot_dimension_numbers<[1], [0], [0], [1], [0, 0, 1, 1], [], []>} : vector<8x256xbf16>, vector<256x128xbf16>, vector<8x128xf32> -> vector<8x128xf32>
    %c0_18 = arith.constant 0 : index
    %c0_19 = arith.constant 0 : index
    %24 = vector.load %arg9[%c0_18, %c0_19] : memref<1x128xf32, #tpu.memory_space<vmem>>, vector<1x128xf32>
    %25 = vector.broadcast %24 : vector<1x128xf32> to vector<8x128xf32>
    %26 = arith.addf %23, %25 : vector<8x128xf32>
    %27 = math.tanh %26 : vector<8x128xf32>
    %28 = arith.truncf %27 : vector<8x128xf32> to vector<8x128xbf16>
    %c0_20 = arith.constant 0 : index
    %c0_21 = arith.constant 0 : index
    %29 = vector.load %arg10[%c0_20, %c0_21] : memref<128x128xbf16, #tpu.memory_space<vmem>>, vector<128x128xbf16>
    %cst_22 = arith.constant dense<0.000000e+00> : vector<8x128xf32>
    %30 = tpu.matmul %28, %29, %cst_22 {dimension_numbers = #tpu.dot_dimension_numbers<[1], [0], [0], [1], [0, 0, 1, 1], [], []>} : vector<8x128xbf16>, vector<128x128xbf16>, vector<8x128xf32> -> vector<8x128xf32>
    %c0_23 = arith.constant 0 : index
    %c0_24 = arith.constant 0 : index
    %31 = vector.load %arg11[%c0_23, %c0_24] : memref<1x128xf32, #tpu.memory_space<vmem>>, vector<1x128xf32>
    %32 = vector.broadcast %31 : vector<1x128xf32> to vector<8x128xf32>
    %33 = arith.addf %30, %32 : vector<8x128xf32>
    %c0_25 = arith.constant 0 : index
    %c0_26 = arith.constant 0 : index
    %34 = vector.load %arg12[%c0_25, %c0_26] : memref<8x128xf32, #tpu.memory_space<vmem>>, vector<8x128xf32>
    tpu.vector_store %arg12[%c0_25, %c0_26], %33 {strides = array<i32>} : memref<8x128xf32, #tpu.memory_space<vmem>>, vector<8x128xf32>,
    return
  }
  func.func @transform_0(%arg0: i32) -> (i32, i32) {
    %c0_i32 = arith.constant 0 : i32
    %c0_i32_0 = arith.constant 0 : i32
    return %arg0, %c0_i32 : i32, i32
  }
  func.func @transform_1(%arg0: i32) -> (i32, i32) {
    %c0_i32 = arith.constant 0 : i32
    %c0_i32_0 = arith.constant 0 : i32
    %c0_i32_1 = arith.constant 0 : i32
    return %c0_i32, %c0_i32_0 : i32, i32
  }
  func.func @transform_2(%arg0: i32) -> (i32, i32) {
    %c0_i32 = arith.constant 0 : i32
    %c0_i32_0 = arith.constant 0 : i32
    %c0_i32_1 = arith.constant 0 : i32
    return %c0_i32, %c0_i32_0 : i32, i32
  }
  func.func @transform_3(%arg0: i32) -> (i32, i32) {
    %c0_i32 = arith.constant 0 : i32
    %c0_i32_0 = arith.constant 0 : i32
    %c0_i32_1 = arith.constant 0 : i32
    return %c0_i32, %c0_i32_0 : i32, i32
  }
  func.func @transform_4(%arg0: i32) -> (i32, i32) {
    %c0_i32 = arith.constant 0 : i32
    %c0_i32_0 = arith.constant 0 : i32
    %c0_i32_1 = arith.constant 0 : i32
    return %c0_i32, %c0_i32_0 : i32, i32
  }
  func.func @transform_5(%arg0: i32) -> (i32, i32) {
    %c0_i32 = arith.constant 0 : i32
    %c0_i32_0 = arith.constant 0 : i32
    %c0_i32_1 = arith.constant 0 : i32
    return %c0_i32, %c0_i32_0 : i32, i32
  }
  func.func @transform_6(%arg0: i32) -> (i32, i32) {
    %c0_i32 = arith.constant 0 : i32
    %c0_i32_0 = arith.constant 0 : i32
    %c0_i32_1 = arith.constant 0 : i32
    return %c0_i32, %c0_i32_0 : i32, i32
  }
  func.func @transform_7(%arg0: i32) -> (i32, i32) {
    %c0_i32 = arith.constant 0 : i32
    %c0_i32_0 = arith.constant 0 : i32
    %c0_i32_1 = arith.constant 0 : i32
    return %c0_i32, %c0_i32_0 : i32, i32
  }
  func.func @transform_8(%arg0: i32) -> (i32, i32) {
    %c0_i32 = arith.constant 0 : i32
    %c0_i32_0 = arith.constant 0 : i32
    %c0_i32_1 = arith.constant 0 : i32
    return %c0_i32, %c0_i32_0 : i32, i32
  }
  func.func @transform_9(%arg0: i32) -> (i32, i32) {
    %c0_i32 = arith.constant 0 : i32
    %c0_i32_0 = arith.constant 0 : i32
    %c0_i32_1 = arith.constant 0 : i32
    return %c0_i32, %c0_i32_0 : i32, i32
  }
  func.func @transform_10(%arg0: i32) -> (i32, i32) {
    %c0_i32 = arith.constant 0 : i32
    %c0_i32_0 = arith.constant 0 : i32
    %c0_i32_1 = arith.constant 0 : i32
    return %c0_i32, %c0_i32_0 : i32, i32
  }
  func.func @transform_11(%arg0: i32) -> (i32, i32) {
    %c0_i32 = arith.constant 0 : i32
    %c0_i32_0 = arith.constant 0 : i32
    return %arg0, %c0_i32 : i32, i32
  }
}

</mosaic_0001>

<bundles_post_ra>
// kernel: tpu_custom_call.1
= control target key start
LH: loop header
LB: loop body
LE: loop exit
PB: predicated region body
PF: predicated region fallthrough
CT: control target
= control target key end

     0   :  { %16 = vsyncpa [#allocation3], 0  ;;  %s4830_s0 = inlined_call_operand.hbm [shape: bf16[8,128], index: 0, kind: input, shape index: {}]   ;;  %s4831_s1 = inlined_call_operand.hbm [shape: bf16[128,1024], index: 1, kind: input, shape index: {}]   ;;  %s4832_s2 = inlined_call_operand.hbm [shape: f32[1,1024], index: 2, kind: input, shape index: {}]   ;;  %s4833_s3 = inlined_call_operand.hbm [shape: bf16[1024,512], index: 3, kind: input, shape index: {}]   ;;  %s4834_s4 = inlined_call_operand.vmem [shape: f32[1,512], index: 4, kind: input, shape index: {}]   ;;  %s4835_s5 = inlined_call_operand.hbm [shape: bf16[512,256], index: 5, kind: input, shape index: {}]   ;;  %s4836_s6 = inlined_call_operand.vmem [shape: f32[1,256], index: 6, kind: input, shape index: {}]   ;;  %s4837_s7 = inlined_call_operand.hbm [shape: bf16[256,128], index: 7, kind: input, shape index: {}]   ;;  %s4838_s8 = inlined_call_operand.vmem [shape: f32[1,128], index: 8, kind: input, shape index: {}]   ;;  %s4839_s9 = inlined_call_operand.hbm [shape: bf16[128,128], index: 9, kind: input, shape index: {}]   ;;  %s4840_s10 = inlined_call_operand.vmem [shape: f32[1,128], index: 10, kind: input, shape index: {}]   ;;  %s4841_s11 = inlined_call_operand.hbm [shape: f32[8,128], index: 11, kind: output, shape index: {}]  }
   0x1   :  { %17 = vsyncpa [#allocation6], 0 }
   0x2   :  { %18 = vsyncpa [#allocation9], 0 }
   0x3   :  { %19 = vsyncpa [#allocation12], 0 }
   0x4   :  { %20 = vsyncpa [#allocation4], 0  ;;  %s4605_s17 = smov [#allocation5]  }
   0x5   :  { %s36_s18 = sshll.u32 %s4605_s17, 4  ;;  %s37_s18 = int_to_ptr.vmem [resolvable:$true] %s36_s18 }
   0x6   :  { %s4443_s19 = scalar_lea.vmem %s37_s18, 8192  ;;  %p4448_p1 = scmp.lt.s32.totalorder %s37_s18, %s37_s18 }
   0x7   :  { %p4444_p0 = scmp.ne.s32.totalorder %s37_s18, %s4443_s19  ;;  %p4449_p2 = scmp.lt.s32.totalorder %s4443_s19, %s4443_s19 }
   0x9   :  { %p4450_p3 = por %p4449_p2, %p4448_p1 }
   0xb   :  { %p4451_p4 = pnand %p4450_p3, %p4444_p0 }
   0xd   :  { %4454 = shalt.err (!%p4451_p4)
}
   0xe   :  { %s4606_s20 = smov 512   ;;  %s4607_s21 = smov 32  }
   0xf   :  { %42 = dma.hbm_to_vmem [thread:$0]  %s4831_s1, 8192, %s37_s18, [#allocation6], %s4606_s20, %s4606_s20, %s4607_s21  }
  0x10   :  { %s4608_s24 = smov [#allocation8]  }
  0x11   :  { %s58_s25 = sshll.u32 %s4608_s24, 4  ;;  %s59_s25 = int_to_ptr.vmem [resolvable:$true] %s58_s25 }
  0x12   :  { %s4463_s26 = scalar_lea.vmem %s59_s25, 32768  ;;  %p4468_p6 = scmp.lt.s32.totalorder %s59_s25, %s59_s25 }
  0x13   :  { %p4464_p5 = scmp.ne.s32.totalorder %s59_s25, %s4463_s26  ;;  %p4469_p7 = scmp.lt.s32.totalorder %s4463_s26, %s4463_s26 }
  0x15   :  { %p4470_p8 = por %p4469_p7, %p4468_p6 }
  0x17   :  { %p4471_p9 = pnand %p4470_p8, %p4464_p5 }
  0x19   :  { %4474 = shalt.err (!%p4471_p9)
}
  0x1a   :  { %s4609_s27 = smov 256   ;;  %s4610_s28 = smov 16  }
  0x1b   :  { %64 = dma.hbm_to_vmem [thread:$0]  %s4833_s3, 32768, %s59_s25, [#allocation9], %s4609_s27, %s4609_s27, %s4610_s28  }
  0x1c   :  { %s4611_s12 = smov [#allocation11]  }
  0x1d   :  { %s86_s13 = sshll.u32 %s4611_s12, 4  ;;  %s87_s13 = int_to_ptr.vmem [resolvable:$true] %s86_s13 }
  0x1e   :  { %s4483_s1 = scalar_lea.vmem %s87_s13, 2048  ;;  %p4488_p11 = scmp.lt.s32.totalorder %s87_s13, %s87_s13 }
  0x1f   :  { %p4484_p10 = scmp.ne.s32.totalorder %s87_s13, %s4483_s1  ;;  %p4489_p12 = scmp.lt.s32.totalorder %s4483_s1, %s4483_s1 }
  0x21   :  { %p4490_p13 = por %p4489_p12, %p4488_p11 }
  0x23   :  { %p4491_p0 = pnand %p4490_p13, %p4484_p10 }
  0x25   :  { %4494 = shalt.err (!%p4491_p0)
}
  0x26   :  { %s4612_s14 = smov 64   ;;  %s4613_s15 = smov 4  }
  0x27   :  { %92 = dma.hbm_to_vmem [thread:$0]  %s4837_s7, 2048, %s87_s13, [#allocation12], %s4612_s14, %s4612_s14, %s4613_s15  }
  0x28   :  { %s4614_s3 = smov [#allocation2]   ;;  %s4615_s19 = smov [#allocation7]  }
  0x29   :  { %s27_s18 = sshll.u32 %s4614_s3, 4  ;;  %s49_s20 = sshll.u32 %s4615_s19, 4  ;;  %s28_s18 = int_to_ptr.vmem [resolvable:$true] %s27_s18  ;;  %s50_s20 = int_to_ptr.vmem [resolvable:$true] %s49_s20 }
  0x2a   :  { %s4503_s21 = scalar_lea.vmem %s28_s18, 64  ;;  %p4508_p2 = scmp.lt.s32.totalorder %s28_s18, %s28_s18 }
  0x2b   :  { %p4504_p1 = scmp.ne.s32.totalorder %s28_s18, %s4503_s21  ;;  %p4509_p3 = scmp.lt.s32.totalorder %s4503_s21, %s4503_s21 }
  0x2d   :  { %p4510_p4 = por %p4509_p3, %p4508_p2 }
  0x2f   :  { %p4511_p5 = pnand %p4510_p4, %p4504_p1 }
  0x31   :  { %4514 = shalt.err (!%p4511_p5)
}
  0x32   :  { %30 = dma.hbm_to_vmem [thread:$0]  %s4830_s0, 64, %s28_s18, [#allocation3]  }
  0x33   :  { %s4523_s24 = scalar_lea.vmem %s50_s20, 128  ;;  %p4528_p7 = scmp.lt.s32.totalorder %s50_s20, %s50_s20 }
  0x34   :  { %p4524_p6 = scmp.ne.s32.totalorder %s50_s20, %s4523_s24  ;;  %p4529_p8 = scmp.lt.s32.totalorder %s4523_s24, %s4523_s24 }
  0x36   :  { %p4530_p9 = por %p4529_p8, %p4528_p7 }
  0x38   :  { %p4531_p10 = pnand %p4530_p9, %p4524_p6 }
  0x3a   :  { %4534 = shalt.err (!%p4531_p10)
}
  0x3b   :  { %52 = dma.hbm_to_vmem [thread:$0]  %s4832_s2, 128, %s50_s20, [#allocation6]  }
  0x3c   :  { %s4616_s26 = smov [#allocation10]  }
  0x3d   :  { %s72_s27 = sshll.u32 %s4616_s26, 4  ;;  %s73_s27 = int_to_ptr.vmem [resolvable:$true] %s72_s27 }
  0x3e   :  { %s4543_s28 = scalar_lea.vmem %s73_s27, 8192  ;;  %p4548_p12 = scmp.lt.s32.totalorder %s73_s27, %s73_s27 }
  0x3f   :  { %p4544_p11 = scmp.ne.s32.totalorder %s73_s27, %s4543_s28  ;;  %p4549_p13 = scmp.lt.s32.totalorder %s4543_s28, %s4543_s28 }
  0x41   :  { %p4550_p0 = por %p4549_p13, %p4548_p12 }
  0x43   :  { %p4551_p1 = pnand %p4550_p0, %p4544_p11 }
  0x45   :  { %4554 = shalt.err (!%p4551_p1)
}
  0x46   :  { %s4617_s0 = smov 128   ;;  %s4618_s29 = smov 8  }
  0x47   :  { %78 = dma.hbm_to_vmem [thread:$0]  %s4835_s5, 8192, %s73_s27, [#allocation9], %s4617_s0, %s4617_s0, %s4618_s29  }
  0x48   :  { %s4619_s13 = smov [#allocation13]  }
  0x49   :  { %s100_s1 = sshll.u32 %s4619_s13, 4  ;;  %s101_s1 = int_to_ptr.vmem [resolvable:$true] %s100_s1 }
  0x4a   :  { %s4563_s2 = scalar_lea.vmem %s101_s1, 1024  ;;  %p4568_p3 = scmp.lt.s32.totalorder %s101_s1, %s101_s1 }
  0x4b   :  { %p4564_p2 = scmp.ne.s32.totalorder %s101_s1, %s4563_s2  ;;  %p4569_p4 = scmp.lt.s32.totalorder %s4563_s2, %s4563_s2 }
  0x4d   :  { %p4570_p5 = por %p4569_p4, %p4568_p3 }
  0x4f   :  { %p4571_p6 = pnand %p4570_p5, %p4564_p2 }
  0x51   :  { %4574 = shalt.err (!%p4571_p6)
}
  0x52   :  { %106 = dma.hbm_to_vmem [thread:$0]  %s4839_s9, 1024, %s101_s1, [#allocation12], %s4612_s14, %s4612_s14, %s4613_s15  }
  0x53   :  { %4595 = dma.done.wait [#allocation3], 64  }
  0x54   :  { %4596 = vsyncadd [#allocation3], 4294967232 }
  0x55   :  { %4597 = dma.done.wait [#allocation6], 8320  }
  0x56   :  { %4598 = vsyncadd [#allocation6], 4294958976 }
  0x57   :  { %4599 = dma.done.wait [#allocation9], 40960  }
  0x58   :  { %4600 = vsyncadd [#allocation9], 4294926336 }
  0x59   :  { %4601 = dma.done.wait [#allocation12], 3072  }
  0x5a   :  { %4602 = vsyncadd [#allocation12], 4294964224  ;;  %v4620_v0 = vmov 0   ;;  %v188_v1 = vld [vmem:[#allocation5 + $0x1c0] sm:$0xff]  ;;  %v189_v3 = vld [vmem:[#allocation5 + $0x1c8] sm:$0xff]  ;;  %vm4622_vm0 = vmmov 0  }
  0x5b   :  { %590 = vmatprep.mubr.bf16.mxu0 %v4620_v0  ;;  %631 = vmatprep.mubr.bf16.mxu1 %v4620_v0  ;;  %v192_v2 = vld [vmem:[#allocation5 + $0x1e0] sm:$0xff]  ;;  %v193_v5 = vld [vmem:[#allocation5 + $0x1e8] sm:$0xff]  ;;  %v190_v62 = vld [vmem:[#allocation5 + $0x1d0] sm:$0xff]  ;;  %s4623_s19 = smov [#allocation14]  }
  0x5c   :  { %v3478_v4 = vcombine.high %v188_v1, %v192_v2  ;;  %v3477_v6 = vcombine.low %v188_v1, %v192_v2  ;;  %v180_v7 = vld [vmem:[#allocation5 + $0x180] sm:$0xff]  ;;  %v3480_v9 = vcombine.high %v189_v3, %v193_v5  ;;  %v3479_v10 = vcombine.low %v189_v3, %v193_v5  ;;  %v181_v12 = vld [vmem:[#allocation5 + $0x188] sm:$0xff]  ;;  %v194_v1 = vld [vmem:[#allocation5 + $0x1f0] sm:$0xff]  ;;  %s3409_s20 = sshll.u32 %s4623_s19, 4  ;;  %s3410_s20 = int_to_ptr.vmem [resolvable:$true] %s3409_s20 }
  0x5d   :  { %v184_v8 = vld [vmem:[#allocation5 + $0x1a0] sm:$0xff]  ;;  %v185_v13 = vld [vmem:[#allocation5 + $0x1a8] sm:$0xff]  ;;  %v191_v2 = vld [vmem:[#allocation5 + $0x1d8] sm:$0xff]  ;;  %p4580_p8 = scmp.lt.s32.totalorder %s3410_s20, %s3410_s20 }
  0x5e   :  { %v3470_v11 = vcombine.high %v180_v7, %v184_v8  ;;  %v172_v14 = vld [vmem:[#allocation5 + $0x140] sm:$0xff]  ;;  %558 = vmatprep.subr.bf16.mxu0 %v3478_v4  ;;  %v3472_v15 = vcombine.high %v181_v12, %v185_v13  ;;  %v173_v17 = vld [vmem:[#allocation5 + $0x148] sm:$0xff]  ;;  %599 = vmatprep.subr.bf16.mxu1 %v3480_v9  ;;  %v3469_v19 = vcombine.low %v180_v7, %v184_v8  ;;  %v195_v3 = vld [vmem:[#allocation5 + $0x1f8] sm:$0xff] }
  0x5f   :  { %v176_v16 = vld [vmem:[#allocation5 + $0x160] sm:$0xff]  ;;  %v177_v18 = vld [vmem:[#allocation5 + $0x168] sm:$0xff]  ;;  %559 = vmatpush1.bf16.msra.mxu0 %v3477_v6  ;;  %600 = vmatpush1.bf16.msra.mxu1 %v3479_v10  ;;  %v3471_v20 = vcombine.low %v181_v12, %v185_v13  ;;  %v3482_v6 = vcombine.high %v190_v62, %v194_v1  ;;  %v182_v7 = vld [vmem:[#allocation5 + $0x190] sm:$0xff]  ;;  %v3484_v8 = vcombine.high %v191_v2, %v195_v3 }
  0x60   :  { %560 = vmatprep.subr.bf16.mxu0 %v3470_v11  ;;  %v3462_v21 = vcombine.high %v172_v14, %v176_v16  ;;  %601 = vmatprep.subr.bf16.mxu1 %v3472_v15  ;;  %v3464_v22 = vcombine.high %v173_v17, %v177_v18  ;;  %v164_v23 = vld [vmem:[#allocation5 + $0x100] sm:$0xff]  ;;  %v165_v25 = vld [vmem:[#allocation5 + $0x108] sm:$0xff]  ;;  %v3461_v27 = vcombine.low %v172_v14, %v176_v16  ;;  %v186_v9 = vld [vmem:[#allocation5 + $0x1b0] sm:$0xff] }
  0x61   :  { %v168_v24 = vld [vmem:[#allocation5 + $0x120] sm:$0xff]  ;;  %v169_v26 = vld [vmem:[#allocation5 + $0x128] sm:$0xff]  ;;  %v3463_v28 = vcombine.low %v173_v17, %v177_v18  ;;  %v183_v10 = vld [vmem:[#allocation5 + $0x198] sm:$0xff]  ;;  %v3481_v13 = vcombine.low %v190_v62, %v194_v1  ;;  %v3483_v14 = vcombine.low %v191_v2, %v195_v3  ;;  %v3474_v15 = vcombine.high %v182_v7, %v186_v9 }
  0x62   :  { %v3454_v29 = vcombine.high %v164_v23, %v168_v24  ;;  %v3456_v30 = vcombine.high %v165_v25, %v169_v26  ;;  %v156_v31 = vld [vmem:[#allocation5 + $0xc0] sm:$0xff]  ;;  %v157_v33 = vld [vmem:[#allocation5 + $0xc8] sm:$0xff]  ;;  %v3453_v35 = vcombine.low %v164_v23, %v168_v24  ;;  %v3455_v36 = vcombine.low %v165_v25, %v169_v26  ;;  %v187_v11 = vld [vmem:[#allocation5 + $0x1b8] sm:$0xff] }
  0x63   :  { %561 = vmatpush1.bf16.msra.mxu0 %v3469_v19  ;;  %602 = vmatpush1.bf16.msra.mxu1 %v3471_v20  ;;  %v160_v32 = vld [vmem:[#allocation5 + $0xe0] sm:$0xff]  ;;  %v161_v34 = vld [vmem:[#allocation5 + $0xe8] sm:$0xff]  ;;  %v4713_v12 = vld [vmem:[#allocation2] sm:$0xf]  ;;  %v3476_v17 = vcombine.high %v183_v10, %v187_v11 }
  0x64   :  { %562 = vmatprep.subr.bf16.mxu0 %v3462_v21  ;;  %603 = vmatprep.subr.bf16.mxu1 %v3464_v22  ;;  %v3446_v37 = vcombine.high %v156_v31, %v160_v32  ;;  %v3448_v38 = vcombine.high %v157_v33, %v161_v34  ;;  %v148_v39 = vld [vmem:[#allocation5 + $0x80] sm:$0xff]  ;;  %v149_v41 = vld [vmem:[#allocation5 + $0x88] sm:$0xff]  ;;  %v3445_v43 = vcombine.low %v156_v31, %v160_v32  ;;  %v174_v16 = vld [vmem:[#allocation5 + $0x150] sm:$0xff] }
  0x65   :  { %v152_v40 = vld [vmem:[#allocation5 + $0xa0] sm:$0xff]  ;;  %v153_v42 = vld [vmem:[#allocation5 + $0xa8] sm:$0xff]  ;;  %v3447_v44 = vcombine.low %v157_v33, %v161_v34  ;;  %v178_v18 = vld [vmem:[#allocation5 + $0x170] sm:$0xff]  ;;  %v3473_v21 = vcombine.low %v182_v7, %v186_v9  ;;  %v3475_v22 = vcombine.low %v183_v10, %v187_v11 }
  0x66   :  { %v3438_v45 = vcombine.high %v148_v39, %v152_v40  ;;  %v3440_v46 = vcombine.high %v149_v41, %v153_v42  ;;  %v140_v47 = vld [vmem:[#allocation5 + $0x40] sm:$0xff]  ;;  %v141_v49 = vld [vmem:[#allocation5 + $0x48] sm:$0xff]  ;;  %v3437_v51 = vcombine.low %v148_v39, %v152_v40  ;;  %v3439_v52 = vcombine.low %v149_v41, %v153_v42  ;;  %v175_v19 = vld [vmem:[#allocation5 + $0x158] sm:$0xff] }
  0x67   :  { %563 = vmatpush1.bf16.msra.mxu0 %v3461_v27  ;;  %604 = vmatpush1.bf16.msra.mxu1 %v3463_v28  ;;  %v144_v48 = vld [vmem:[#allocation5 + $0x60] sm:$0xff]  ;;  %v145_v50 = vld [vmem:[#allocation5 + $0x68] sm:$0xff]  ;;  %v179_v20 = vld [vmem:[#allocation5 + $0x178] sm:$0xff]  ;;  %v3466_v23 = vcombine.high %v174_v16, %v178_v18 }
  0x68   :  { %564 = vmatprep.subr.bf16.mxu0 %v3454_v29  ;;  %605 = vmatprep.subr.bf16.mxu1 %v3456_v30  ;;  %v3430_v53 = vcombine.high %v140_v47, %v144_v48  ;;  %v132_v54 = vld [vmem:[#allocation5] sm:$0xff]  ;;  %v3432_v55 = vcombine.high %v141_v49, %v145_v50  ;;  %v133_v57 = vld [vmem:[#allocation5 + $0x8] sm:$0xff]  ;;  %v3429_v59 = vcombine.low %v140_v47, %v144_v48  ;;  %v166_v24 = vld [vmem:[#allocation5 + $0x110] sm:$0xff] }
  0x69   :  { %v136_v56 = vld [vmem:[#allocation5 + $0x20] sm:$0xff]  ;;  %v137_v58 = vld [vmem:[#allocation5 + $0x28] sm:$0xff]  ;;  %v3431_v60 = vcombine.low %v141_v49, %v145_v50  ;;  %v3468_v25 = vcombine.high %v175_v19, %v179_v20  ;;  %v170_v26 = vld [vmem:[#allocation5 + $0x130] sm:$0xff]  ;;  %v3465_v29 = vcombine.low %v174_v16, %v178_v18  ;;  %v3467_v30 = vcombine.low %v175_v19, %v179_v20 }
  0x6a   :  { %v3422_v61 = vcombine.high %v132_v54, %v136_v56  ;;  %v3424_v63 = vcombine.high %v133_v57, %v137_v58  ;;  %v3421_v4 = vcombine.low %v132_v54, %v136_v56  ;;  %v3423_v5 = vcombine.low %v133_v57, %v137_v58  ;;  %v167_v27 = vld [vmem:[#allocation5 + $0x118] sm:$0xff]  ;;  %v158_v32 = vld [vmem:[#allocation5 + $0xd0] sm:$0xff] }
  0x6b   :  { %565 = vmatpush1.bf16.msra.mxu0 %v3453_v35  ;;  %606 = vmatpush1.bf16.msra.mxu1 %v3455_v36  ;;  %v171_v28 = vld [vmem:[#allocation5 + $0x138] sm:$0xff]  ;;  %v3458_v31 = vcombine.high %v166_v24, %v170_v26  ;;  %v162_v34 = vld [vmem:[#allocation5 + $0xf0] sm:$0xff] }
  0x6c   :  { %566 = vmatprep.subr.bf16.mxu0 %v3446_v37  ;;  %607 = vmatprep.subr.bf16.mxu1 %v3448_v38  ;;  %v3460_v33 = vcombine.high %v167_v27, %v171_v28  ;;  %v159_v35 = vld [vmem:[#allocation5 + $0xd8] sm:$0xff]  ;;  %v3457_v37 = vcombine.low %v166_v24, %v170_v26  ;;  %v3459_v38 = vcombine.low %v167_v27, %v171_v28  ;;  %v150_v40 = vld [vmem:[#allocation5 + $0x90] sm:$0xff] }
  0x6d   :  { %v163_v36 = vld [vmem:[#allocation5 + $0xf8] sm:$0xff]  ;;  %v3450_v39 = vcombine.high %v158_v32, %v162_v34  ;;  %v154_v41 = vld [vmem:[#allocation5 + $0xb0] sm:$0xff] }
  0x6e   :  { %v151_v42 = vld [vmem:[#allocation5 + $0x98] sm:$0xff]  ;;  %v142_v47 = vld [vmem:[#allocation5 + $0x50] sm:$0xff] }
  0x6f   :  { %567 = vmatpush1.bf16.msra.mxu0 %v3445_v43  ;;  %608 = vmatpush1.bf16.msra.mxu1 %v3447_v44  ;;  %v155_v43 = vld [vmem:[#allocation5 + $0xb8] sm:$0xff]  ;;  %v3449_v44 = vcombine.low %v158_v32, %v162_v34  ;;  %v146_v49 = vld [vmem:[#allocation5 + $0x70] sm:$0xff] }
  0x70   :  { %568 = vmatprep.subr.bf16.mxu0 %v3438_v45  ;;  %609 = vmatprep.subr.bf16.mxu1 %v3440_v46  ;;  %v3451_v45 = vcombine.low %v159_v35, %v163_v36  ;;  %v3442_v46 = vcombine.high %v150_v40, %v154_v41  ;;  %v3444_v48 = vcombine.high %v151_v42, %v155_v43  ;;  %v143_v50 = vld [vmem:[#allocation5 + $0x58] sm:$0xff]  ;;  %v138_v54 = vld [vmem:[#allocation5 + $0x30] sm:$0xff] }
  0x71   :  { %v3434_v56 = vcombine.high %v142_v47, %v146_v49  ;;  %v135_v57 = vld [vmem:[#allocation5 + $0x18] sm:$0xff] }
  0x72   :  { %v139_v58 = vld [vmem:[#allocation5 + $0x38] sm:$0xff] }
  0x73   :  { %569 = vmatpush1.bf16.msra.mxu0 %v3437_v51  ;;  %610 = vmatpush1.bf16.msra.mxu1 %v3439_v52  ;;  %v147_v51 = vld [vmem:[#allocation5 + $0x78] sm:$0xff]  ;;  %v3441_v52 = vcombine.low %v150_v40, %v154_v41 }
  0x74   :  { %570 = vmatprep.subr.bf16.mxu0 %v3430_v53  ;;  %611 = vmatprep.subr.bf16.mxu1 %v3432_v55  ;;  %v134_v53 = vld [vmem:[#allocation5 + $0x10] sm:$0xff]  ;;  %v3443_v55 = vcombine.low %v151_v42, %v155_v43  ;;  %v3903_v1 = vld [vmem:[#allocation8 + $0xe4] ss:$16 sps:$4 sm:$0xff]   ;;  %v3907_v9 = vld [vmem:[#allocation8 + $0xc0] ss:$16 sps:$4 sm:$0xff]  }
  0x75   :  { %v3426_v62 = vcombine.high %v134_v53, %v138_v54  ;;  %v3425_v2 = vcombine.low %v134_v53, %v138_v54  ;;  %v3906_v3 = vld [vmem:[#allocation8 + $0x2e4] ss:$16 sps:$4 sm:$0xff]   ;;  %v3910_v10 = vld [vmem:[#allocation8 + $0x2c0] ss:$16 sps:$4 sm:$0xff]  }
  0x76   :  { %v3909_v7 = vld [vmem:[#allocation8 + $0xc4] ss:$16 sps:$4 sm:$0xff]   ;;  %v3919_v18 = vld [vmem:[#allocation8 + $0x80] ss:$16 sps:$4 sm:$0xff]  }
  0x77   :  { %571 = vmatpush1.bf16.msra.mxu0 %v3429_v59  ;;  %612 = vmatpush1.bf16.msra.mxu1 %v3431_v60  ;;  %v3436_v59 = vcombine.high %v143_v50, %v147_v51  ;;  %v3433_v60 = vcombine.low %v142_v47, %v146_v49  ;;  %v3915_v11 = vld [vmem:[#allocation8 + $0xa4] ss:$16 sps:$4 sm:$0xff]   ;;  %v3922_v19 = vld [vmem:[#allocation8 + $0x280] ss:$16 sps:$4 sm:$0xff]  }
  0x78   :  { %572 = vmatprep.subr.bf16.mxu0 %v3422_v61  ;;  %613 = vmatprep.subr.bf16.mxu1 %v3424_v63  ;;  %v3435_v61 = vcombine.low %v143_v50, %v147_v51  ;;  %v3428_v63 = vcombine.high %v135_v57, %v139_v58  ;;  %v3921_v16 = vld [vmem:[#allocation8 + $0x84] ss:$16 sps:$4 sm:$0xff]   ;;  %v3934_v26 = vld [vmem:[#allocation8 + $0x240] ss:$16 sps:$4 sm:$0xff]  }
  0x79   :  { %v3927_v20 = vld [vmem:[#allocation8 + $0x64] ss:$16 sps:$4 sm:$0xff]   ;;  %v3946_v34 = vld [vmem:[#allocation8 + $0x200] ss:$16 sps:$4 sm:$0xff]  }
  0x7a   :  { %v3936_v24 = vld [vmem:[#allocation8 + $0x244] ss:$16 sps:$4 sm:$0xff]   ;;  %v3958_v41 = vld [vmem:[#allocation8 + $0x3c0] ss:$16 sps:$4 sm:$0xff]  }
  0x7b   :  { %573 = vmatpush1.bf16.msra.mxu0 %v3421_v4  ;;  %614 = vmatpush1.bf16.msra.mxu1 %v3423_v5  ;;  %v3427_v4 = vcombine.low %v135_v57, %v139_v58  ;;  %v3901_v5 = vld [vmem:[#allocation8 + $0xe0] ss:$16 sps:$4 sm:$0xff]   ;;  %v3939_v27 = vld [vmem:[#allocation8 + $0x24] ss:$16 sps:$4 sm:$0xff]  }
  0x7c   :  { %640 = vmatprep.subr.bf16.mxu0 %v3482_v6  ;;  %681 = vmatprep.subr.bf16.mxu1 %v3484_v8  ;;  %v3904_v6 = vld [vmem:[#allocation8 + $0x2e0] ss:$16 sps:$4 sm:$0xff]   ;;  %v3912_v8 = vld [vmem:[#allocation8 + $0x2c4] ss:$16 sps:$4 sm:$0xff]  }
  0x7d   :  { %v3942_v28 = vld [vmem:[#allocation8 + $0x224] ss:$16 sps:$4 sm:$0xff]   ;;  %v3970_v49 = vld [vmem:[#allocation8 + $0x380] ss:$16 sps:$4 sm:$0xff]  }
  0x7e   :  { %591 = vmatmul.mubr.bf16.vlgmr.msra.gmra.mxu0 %v4713_v12  ;;  %632 = vmatmul.mubr.bf16.vlgmr.msra.gmra.mxu1 %v4713_v12  ;;  %v3948_v32 = vld [vmem:[#allocation8 + $0x204] ss:$16 sps:$4 sm:$0xff]   ;;  %v3976_v53 = vld [vmem:[#allocation8 + $0x360] ss:$16 sps:$4 sm:$0xff]  }
  0x7f   :  { %641 = vmatpush1.bf16.msra.mxu0 %v3481_v13  ;;  %682 = vmatpush1.bf16.msra.mxu1 %v3483_v14  ;;  %v3918_v13 = vld [vmem:[#allocation8 + $0x2a4] ss:$16 sps:$4 sm:$0xff]   ;;  %v3913_v14 = vld [vmem:[#allocation8 + $0xa0] ss:$16 sps:$4 sm:$0xff]  }
  0x80   :  { %642 = vmatprep.subr.bf16.mxu0 %v3474_v15  ;;  %683 = vmatprep.subr.bf16.mxu1 %v3476_v17  ;;  %v3916_v15 = vld [vmem:[#allocation8 + $0x2a0] ss:$16 sps:$4 sm:$0xff]   ;;  %v3924_v17 = vld [vmem:[#allocation8 + $0x284] ss:$16 sps:$4 sm:$0xff]  }
  0x81   :  { %672 = vmatprep.mubr.bf16.mxu0 %v4620_v0  ;;  %713 = vmatprep.mubr.bf16.mxu1 %v4620_v0  ;;  %v3452_v0 = vcombine.high %v159_v35, %v163_v36  ;;  %v3951_v35 = vld [vmem:[#allocation8 + $0x1e4] ss:$16 sps:$4 sm:$0xff]   ;;  %v3982_v57 = vld [vmem:[#allocation8 + $0x340] ss:$16 sps:$4 sm:$0xff]  }
  0x82   :  { %v3954_v36 = vld [vmem:[#allocation8 + $0x3e4] ss:$16 sps:$4 sm:$0xff]  }
  0x83   :  { %643 = vmatpush1.bf16.msra.mxu0 %v3473_v21  ;;  %684 = vmatpush1.bf16.msra.mxu1 %v3475_v22  ;;  %v3930_v21 = vld [vmem:[#allocation8 + $0x264] ss:$16 sps:$4 sm:$0xff]   ;;  %v3928_v22 = vld [vmem:[#allocation8 + $0x260] ss:$16 sps:$4 sm:$0xff]  }
  0x84   :  { %644 = vmatprep.subr.bf16.mxu0 %v3466_v23  ;;  %685 = vmatprep.subr.bf16.mxu1 %v3468_v25  ;;  %v3933_v23 = vld [vmem:[#allocation8 + $0x44] ss:$16 sps:$4 sm:$0xff]   ;;  %v3931_v25 = vld [vmem:[#allocation8 + $0x40] ss:$16 sps:$4 sm:$0xff]  }
  0x85   :  { %v3960_v40 = vld [vmem:[#allocation8 + $0x3c4] ss:$16 sps:$4 sm:$0xff]  }
  0x86   :  { %v3963_v42 = vld [vmem:[#allocation8 + $0x1a4] ss:$16 sps:$4 sm:$0xff]  }
  0x87   :  { %645 = vmatpush1.bf16.msra.mxu0 %v3465_v29  ;;  %686 = vmatpush1.bf16.msra.mxu1 %v3467_v30  ;;  %v3937_v29 = vld [vmem:[#allocation8 + $0x20] ss:$16 sps:$4 sm:$0xff]   ;;  %v3966_v43 = vld [vmem:[#allocation8 + $0x3a4] ss:$16 sps:$4 sm:$0xff]  }
  0x88   :  { %646 = vmatprep.subr.bf16.mxu0 %v3458_v31  ;;  %687 = vmatprep.subr.bf16.mxu1 %v3460_v33  ;;  %v3940_v30 = vld [vmem:[#allocation8 + $0x220] ss:$16 sps:$4 sm:$0xff]   ;;  %v3945_v31 = vld [vmem:[#allocation8 + $0x4] ss:$16 sps:$4 sm:$0xff]  }
  0x89   :  { %v3943_v33 = vld [vmem:[#allocation8] ss:$16 sps:$4 sm:$0xff]   ;;  %v3972_v47 = vld [vmem:[#allocation8 + $0x384] ss:$16 sps:$4 sm:$0xff]  }
  0x8a   :  { %v3975_v50 = vld [vmem:[#allocation8 + $0x164] ss:$16 sps:$4 sm:$0xff]  }
  0x8b   :  { %647 = vmatpush1.bf16.msra.mxu0 %v3457_v37  ;;  %688 = vmatpush1.bf16.msra.mxu1 %v3459_v38  ;;  %v3949_v37 = vld [vmem:[#allocation8 + $0x1e0] ss:$16 sps:$4 sm:$0xff]   ;;  %v3978_v51 = vld [vmem:[#allocation8 + $0x364] ss:$16 sps:$4 sm:$0xff]  }
  0x8c   :  { %648 = vmatprep.subr.bf16.mxu0 %v3450_v39  ;;  %689 = vmatprep.subr.bf16.mxu1 %v3452_v0  ;;  %v3952_v38 = vld [vmem:[#allocation8 + $0x3e0] ss:$16 sps:$4 sm:$0xff]   ;;  %v3957_v39 = vld [vmem:[#allocation8 + $0x1c4] ss:$16 sps:$4 sm:$0xff]  }
  0x8d   :  { %v3955_v0 = vld [vmem:[#allocation8 + $0x1c0] ss:$16 sps:$4 sm:$0xff]   ;;  %v3981_v54 = vld [vmem:[#allocation8 + $0x144] ss:$16 sps:$4 sm:$0xff]  }
  0x8e   :  { %v3987_v58 = vld [vmem:[#allocation8 + $0x124] ss:$16 sps:$4 sm:$0xff]  }
  0x8f   :  { %649 = vmatpush1.bf16.msra.mxu0 %v3449_v44  ;;  %690 = vmatpush1.bf16.msra.mxu1 %v3451_v45  ;;  %v3961_v44 = vld [vmem:[#allocation8 + $0x1a0] ss:$16 sps:$4 sm:$0xff]  }
  0x90   :  { %650 = vmatprep.subr.bf16.mxu0 %v3442_v46  ;;  %691 = vmatprep.subr.bf16.mxu1 %v3444_v48  ;;  %v3964_v45 = vld [vmem:[#allocation8 + $0x3a0] ss:$16 sps:$4 sm:$0xff]   ;;  %v3969_v46 = vld [vmem:[#allocation8 + $0x184] ss:$16 sps:$4 sm:$0xff]  }
  0x91   :  { %v3967_v48 = vld [vmem:[#allocation8 + $0x180] ss:$16 sps:$4 sm:$0xff]  }
  0x93   :  { %651 = vmatpush1.bf16.msra.mxu0 %v3441_v52  ;;  %692 = vmatpush1.bf16.msra.mxu1 %v3443_v55  ;;  %v3973_v52 = vld [vmem:[#allocation8 + $0x160] ss:$16 sps:$4 sm:$0xff]   ;;  %v3984_v55 = vld [vmem:[#allocation8 + $0x344] ss:$16 sps:$4 sm:$0xff]  }
  0x94   :  { %652 = vmatprep.subr.bf16.mxu0 %v3434_v56  ;;  %693 = vmatprep.subr.bf16.mxu1 %v3436_v59  ;;  %v3979_v56 = vld [vmem:[#allocation8 + $0x140] ss:$16 sps:$4 sm:$0xff]   ;;  %v3990_v59 = vld [vmem:[#allocation8 + $0x324] ss:$16 sps:$4 sm:$0xff]  }
  0x97   :  { %653 = vmatpush1.bf16.msra.mxu0 %v3433_v60  ;;  %694 = vmatpush1.bf16.msra.mxu1 %v3435_v61  ;;  %v3985_v60 = vld [vmem:[#allocation8 + $0x120] ss:$16 sps:$4 sm:$0xff]  }
  0x98   :  { %654 = vmatprep.subr.bf16.mxu0 %v3426_v62  ;;  %695 = vmatprep.subr.bf16.mxu1 %v3428_v63  ;;  %v3988_v61 = vld [vmem:[#allocation8 + $0x320] ss:$16 sps:$4 sm:$0xff]   ;;  %v3993_v62 = vld [vmem:[#allocation8 + $0x104] ss:$16 sps:$4 sm:$0xff]  }
  0x99   :  { %v3996_v63 = vld [vmem:[#allocation8 + $0x304] ss:$16 sps:$4 sm:$0xff]  }
  0x9b   :  { %655 = vmatpush1.bf16.msra.mxu0 %v3425_v2  ;;  %696 = vmatpush1.bf16.msra.mxu1 %v3427_v4  ;;  %v3994_v2 = vld [vmem:[#allocation8 + $0x300] ss:$16 sps:$4 sm:$0xff]   ;;  %v4002_v4 = vld [vmem:[#allocation8 + $0x6e4] ss:$16 sps:$4 sm:$0xff]  }
  0x9c   :  { %2296 = vmatprep.subr.bf16.mxu0 %v3903_v1  ;;  %2337 = vmatprep.subr.bf16.mxu1 %v3906_v3  ;;  %v3991_v1 = vld [vmem:[#allocation8 + $0x100] ss:$16 sps:$4 sm:$0xff]   ;;  %v3999_v3 = vld [vmem:[#allocation8 + $0x4e4] ss:$16 sps:$4 sm:$0xff]  }
  0x9e   :  { %673 = vmatmul.mubr.bf16.vlgmr.msra.gmra.mxu0 %v4713_v12  ;;  %714 = vmatmul.mubr.bf16.vlgmr.msra.gmra.mxu1 %v4713_v12  ;;  %v3925_v12 = vld [vmem:[#allocation8 + $0x60] ss:$16 sps:$4 sm:$0xff]  }
  0x9f   :  { %2297 = vmatpush1.bf16.msra.mxu0 %v3901_v5  ;;  %2338 = vmatpush1.bf16.msra.mxu1 %v3904_v6  ;;  %v198_v5 = vlaneseq }
  0xa0   :  { %2298 = vmatprep.subr.bf16.mxu0 %v3909_v7  ;;  %2339 = vmatprep.subr.bf16.mxu1 %v3912_v8  ;;  %v4726_v8 = vld [vmem:[#allocation7] sm:$0xff] }
  0xa1   :  { %v4721_v6 = vshrl.u32 %v198_v5, 7  ;;  %v4027_v5 = vld [vmem:[#allocation8 + $0x440] ss:$16 sps:$4 sm:$0xff]  }
  0xa3   :  { %2299 = vmatpush1.bf16.msra.mxu0 %v3907_v9  ;;  %2340 = vmatpush1.bf16.msra.mxu1 %v3910_v10  ;;  %v4724_v7 = vsub.s32 0, %v4721_v6  ;;  %v208_v9 = vsub.s32 2, %v4721_v6  ;;  %v4730_v10 = vsub.s32 1, %v4721_v6 }
  0xa4   :  { %2300 = vmatprep.subr.bf16.mxu0 %v3915_v11  ;;  %2341 = vmatprep.subr.bf16.mxu1 %v3918_v13  ;;  %v212_v11 = vsub.s32 3, %v4721_v6 }
  0xa5   :  { %v201_v13 = vrot.slane %v4726_v8, %v4724_v7 }
  0xa7   :  { %2301 = vmatpush1.bf16.msra.mxu0 %v3913_v14  ;;  %2342 = vmatpush1.bf16.msra.mxu1 %v3916_v15  ;;  %v209_v14 = vrot.slane %v4726_v8, %v208_v9  ;;  %v205_v15 = vrot.slane %v4726_v8, %v4730_v10 }
  0xa8   :  { %2302 = vmatprep.subr.bf16.mxu0 %v3921_v16  ;;  %2343 = vmatprep.subr.bf16.mxu1 %v3924_v17  ;;  %v213_v17 = vrot.slane %v4726_v8, %v212_v11 }
  0xab   :  { %2303 = vmatpush1.bf16.msra.mxu0 %v3919_v18  ;;  %2344 = vmatpush1.bf16.msra.mxu1 %v3922_v19 }
  0xac   :  { %2304 = vmatprep.subr.bf16.mxu0 %v3927_v20  ;;  %2345 = vmatprep.subr.bf16.mxu1 %v3930_v21 }
  0xaf   :  { %2305 = vmatpush1.bf16.msra.mxu0 %v3925_v12  ;;  %2346 = vmatpush1.bf16.msra.mxu1 %v3928_v22 }
  0xb0   :  { %2306 = vmatprep.subr.bf16.mxu0 %v3933_v23  ;;  %2347 = vmatprep.subr.bf16.mxu1 %v3936_v24 }
  0xb3   :  { %2307 = vmatpush1.bf16.msra.mxu0 %v3931_v25  ;;  %2348 = vmatpush1.bf16.msra.mxu1 %v3934_v26 }
  0xb4   :  { %2308 = vmatprep.subr.bf16.mxu0 %v3939_v27  ;;  %2349 = vmatprep.subr.bf16.mxu1 %v3942_v28 }
  0xb7   :  { %2309 = vmatpush1.bf16.msra.mxu0 %v3937_v29  ;;  %2350 = vmatpush1.bf16.msra.mxu1 %v3940_v30 }
  0xb8   :  { %2310 = vmatprep.subr.bf16.mxu0 %v3945_v31  ;;  %2351 = vmatprep.subr.bf16.mxu1 %v3948_v32 }
  0xbb   :  { %2311 = vmatpush1.bf16.msra.mxu0 %v3943_v33  ;;  %2352 = vmatpush1.bf16.msra.mxu1 %v3946_v34  ;;  %v3997_v34 = vld [vmem:[#allocation8 + $0x4e0] ss:$16 sps:$4 sm:$0xff]  }
  0xbc   :  { %2312 = vmatprep.subr.bf16.mxu0 %v3951_v35  ;;  %2353 = vmatprep.subr.bf16.mxu1 %v3954_v36 }
  0xbf   :  { %2313 = vmatpush2.bf16.msra.mxu0 %v3949_v37  ;;  %2354 = vmatpush2.bf16.msra.mxu1 %v3952_v38  ;;  %v4000_v37 = vld [vmem:[#allocation8 + $0x6e0] ss:$16 sps:$4 sm:$0xff]   ;;  %v4005_v38 = vld [vmem:[#allocation8 + $0x4c4] ss:$16 sps:$4 sm:$0xff]  }
  0xc0   :  { %2314 = vmatprep.subr.bf16.mxu0 %v3957_v39  ;;  %2355 = vmatprep.subr.bf16.mxu1 %v3960_v40  ;;  %v4008_v39 = vld [vmem:[#allocation8 + $0x6c4] ss:$16 sps:$4 sm:$0xff]   ;;  %v4003_v40 = vld [vmem:[#allocation8 + $0x4c0] ss:$16 sps:$4 sm:$0xff]  }
  0xc3   :  { %2315 = vmatpush2.bf16.msra.mxu0 %v3955_v0  ;;  %2356 = vmatpush2.bf16.msra.mxu1 %v3958_v41  ;;  %v4006_v0 = vld [vmem:[#allocation8 + $0x6c0] ss:$16 sps:$4 sm:$0xff]   ;;  %v4011_v41 = vld [vmem:[#allocation8 + $0x4a4] ss:$16 sps:$4 sm:$0xff]  }
  0xc4   :  { %2316 = vmatprep.subr.bf16.mxu0 %v3963_v42  ;;  %2357 = vmatprep.subr.bf16.mxu1 %v3966_v43  ;;  %v4014_v42 = vld [vmem:[#allocation8 + $0x6a4] ss:$16 sps:$4 sm:$0xff]   ;;  %v4009_v43 = vld [vmem:[#allocation8 + $0x4a0] ss:$16 sps:$4 sm:$0xff]  }
  0xc7   :  { %2317 = vmatpush2.bf16.msra.mxu0 %v3961_v44  ;;  %2358 = vmatpush2.bf16.msra.mxu1 %v3964_v45  ;;  %v220_v44 = vsub.s32 5, %v4721_v6  ;;  %v4012_v45 = vld [vmem:[#allocation8 + $0x6a0] ss:$16 sps:$4 sm:$0xff]  }
  0xc8   :  { %2318 = vmatprep.subr.bf16.mxu0 %v3969_v46  ;;  %2359 = vmatprep.subr.bf16.mxu1 %v3972_v47  ;;  %v4017_v46 = vld [vmem:[#allocation8 + $0x484] ss:$16 sps:$4 sm:$0xff]   ;;  %v228_v47 = vsub.s32 7, %v4721_v6 }
  0xcb   :  { %2319 = vmatpush2.bf16.msra.mxu0 %v3967_v48  ;;  %2360 = vmatpush2.bf16.msra.mxu1 %v3970_v49  ;;  %v4020_v48 = vld [vmem:[#allocation8 + $0x684] ss:$16 sps:$4 sm:$0xff]   ;;  %v4015_v49 = vld [vmem:[#allocation8 + $0x480] ss:$16 sps:$4 sm:$0xff]  }
  0xcc   :  { %2320 = vmatprep.subr.bf16.mxu0 %v3975_v50  ;;  %2361 = vmatprep.subr.bf16.mxu1 %v3978_v51  ;;  %v221_v50 = vrot.slane %v4726_v8, %v220_v44  ;;  %v4018_v51 = vld [vmem:[#allocation8 + $0x680] ss:$16 sps:$4 sm:$0xff]  }
  0xcd   :  { %v4060_v44 = vld [vmem:[#allocation8 + $0x7a0] ss:$16 sps:$4 sm:$0xff]  }
  0xcf   :  { %2321 = vmatpush2.bf16.msra.mxu0 %v3973_v52  ;;  %2362 = vmatpush2.bf16.msra.mxu1 %v3976_v53  ;;  %v4023_v52 = vld [vmem:[#allocation8 + $0x464] ss:$16 sps:$4 sm:$0xff]  }
  0xd0   :  { %2322 = vmatprep.subr.bf16.mxu0 %v3981_v54  ;;  %2363 = vmatprep.subr.bf16.mxu1 %v3984_v55  ;;  %v229_v54 = vrot.slane %v4726_v8, %v228_v47  ;;  %v4026_v55 = vld [vmem:[#allocation8 + $0x664] ss:$16 sps:$4 sm:$0xff]  }
  0xd3   :  { %2323 = vmatpush2.bf16.msra.mxu0 %v3979_v56  ;;  %2364 = vmatpush2.bf16.msra.mxu1 %v3982_v57 }
  0xd4   :  { %2324 = vmatprep.subr.bf16.mxu0 %v3987_v58  ;;  %2365 = vmatprep.subr.bf16.mxu1 %v3990_v59  ;;  %v4021_v58 = vld [vmem:[#allocation8 + $0x460] ss:$16 sps:$4 sm:$0xff]  }
  0xd7   :  { %2325 = vmatpush2.bf16.msra.mxu0 %v3985_v60  ;;  %2366 = vmatpush2.bf16.msra.mxu1 %v3988_v61  ;;  %v4024_v61 = vld [vmem:[#allocation8 + $0x660] ss:$16 sps:$4 sm:$0xff]  }
  0xd8   :  { %2326 = vmatprep.subr.bf16.mxu0 %v3993_v62  ;;  %2367 = vmatprep.subr.bf16.mxu1 %v3996_v63  ;;  %v4029_v62 = vld [vmem:[#allocation8 + $0x444] ss:$16 sps:$4 sm:$0xff]  }
  0xdb   :  { %2327 = vmatpush2.bf16.msra.mxu0 %v3991_v1  ;;  %2368 = vmatpush2.bf16.msra.mxu1 %v3994_v2  ;;  %v4032_v2 = vld [vmem:[#allocation8 + $0x644] ss:$16 sps:$4 sm:$0xff]  }
  0xdc   :  { %2378 = vmatprep.subr.bf16.mxu0 %v3999_v3  ;;  %2419 = vmatprep.subr.bf16.mxu1 %v4002_v4 }
 0x13e   :  { %v592_v16 = vpop.f32.mrf.mxu0  ;;  %v633_v19 = vpop.f32.mrf.mxu1 }
 0x13f   :  { %v593_v18 = vadd.f32 %v592_v16, %v201_v13  ;;  %v634_v20 = vadd.f32 %v633_v19, %v209_v14  ;;  %v4030_v14 = vld [vmem:[#allocation8 + $0x640] ss:$16 sps:$4 sm:$0xff]   ;;  %v4038_v16 = vld [vmem:[#allocation8 + $0x624] ss:$16 sps:$4 sm:$0xff]  }
 0x140   :  { %v594_v21 = vpop.f32.mrf.mxu0  ;;  %v635_v22 = vpop.f32.mrf.mxu1  ;;  %v4041_v19 = vld [vmem:[#allocation8 + $0x404] ss:$16 sps:$4 sm:$0xff]  }
 0x141   :  { %4405 = vtanh.f32 %v593_v18  ;;  %v595_v12 = vadd.f32 %v594_v21, %v205_v15  ;;  %v636_v23 = vadd.f32 %v635_v22, %v213_v17  ;;  %v4035_v15 = vld [vmem:[#allocation8 + $0x424] ss:$16 sps:$4 sm:$0xff]   ;;  %v4033_v17 = vld [vmem:[#allocation8 + $0x420] ss:$16 sps:$4 sm:$0xff]  }
 0x142   :  { %4407 = vtanh.f32 %v634_v20  ;;  %v596_v24 = vpop.f32.mrf.mxu0  ;;  %v637_v25 = vpop.f32.mrf.mxu1  ;;  %v4036_v18 = vld [vmem:[#allocation8 + $0x620] ss:$16 sps:$4 sm:$0xff]   ;;  %v4044_v20 = vld [vmem:[#allocation8 + $0x604] ss:$16 sps:$4 sm:$0xff]  }
 0x143   :  { %4409 = vtanh.f32 %v595_v12  ;;  %v4039_v21 = vld [vmem:[#allocation8 + $0x400] ss:$16 sps:$4 sm:$0xff]   ;;  %v4047_v22 = vld [vmem:[#allocation8 + $0x5e4] ss:$16 sps:$4 sm:$0xff]  }
 0x144   :  { %4411 = vtanh.f32 %v636_v23  ;;  %v597_v26 = vpop.f32.mrf.mxu0  ;;  %v638_v27 = vpop.f32.mrf.mxu1  ;;  %v4042_v12 = vld [vmem:[#allocation8 + $0x600] ss:$16 sps:$4 sm:$0xff]   ;;  %v4050_v23 = vld [vmem:[#allocation8 + $0x7e4] ss:$16 sps:$4 sm:$0xff]  }
 0x145   :  { %v4045_v26 = vld [vmem:[#allocation8 + $0x5e0] ss:$16 sps:$4 sm:$0xff]  }
 0x14e   :  { %v4406_v28 = vpop.eup %4405 }
 0x14f   :  { %v4408_v29 = vpop.eup %4407  ;;  %v4747_v35 = vpack.c.bf16 %v4406_v28, %v4406_v28  ;;  %v4048_v28 = vld [vmem:[#allocation8 + $0x7e0] ss:$16 sps:$4 sm:$0xff]  }
 0x150   :  { %v4410_v30 = vpop.eup %4409  ;;  %v4743_v32 = vpack.c.bf16 %v4408_v29, %v4408_v29  ;;  %v4053_v29 = vld [vmem:[#allocation8 + $0x5c4] ss:$16 sps:$4 sm:$0xff]  }
 0x151   :  { %v4412_v31 = vpop.eup %4411  ;;  %v4745_v33 = vpack.c.bf16 %v4410_v30, %v4410_v30 }
 0x152   :  { %v4749_v36 = vpack.c.bf16 %v4412_v31, %v4412_v31  ;;  %v4056_v31 = vld [vmem:[#allocation8 + $0x7c4] ss:$16 sps:$4 sm:$0xff]  }
 0x153   :  { %2328 = vmatprep.mubr.bf16.mxu0 %v4745_v33 }
 0x154   :  { %2369 = vmatprep.mubr.bf16.mxu1 %v4749_v36  ;;  %2329 = vmatmul.mubr.bf16.vlgmr.msra.gmra.mxu0 %v4747_v35 }
 0x155   :  { %2370 = vmatmul.mubr.bf16.vlgmr.msra.gmra.mxu1 %v4743_v32  ;;  %2379 = vmatpush1.bf16.msra.mxu0 %v3997_v34  ;;  %v4051_v34 = vld [vmem:[#allocation8 + $0x5c0] ss:$16 sps:$4 sm:$0xff]  }
 0x156   :  { %2420 = vmatpush1.bf16.msra.mxu1 %v4000_v37  ;;  %2380 = vmatprep.subr.bf16.mxu0 %v4005_v38  ;;  %v224_v37 = vsub.s32 6, %v4721_v6  ;;  %v4054_v38 = vld [vmem:[#allocation8 + $0x7c0] ss:$16 sps:$4 sm:$0xff]  }
 0x157   :  { %2421 = vmatprep.subr.bf16.mxu1 %v4008_v39  ;;  %v216_v39 = vsub.s32 4, %v4721_v6 }
 0x159   :  { %2381 = vmatpush1.bf16.msra.mxu0 %v4003_v40  ;;  %v4059_v40 = vld [vmem:[#allocation8 + $0x5a4] ss:$16 sps:$4 sm:$0xff]  }
 0x15a   :  { %2422 = vmatpush1.bf16.msra.mxu1 %v4006_v0  ;;  %2382 = vmatprep.subr.bf16.mxu0 %v4011_v41  ;;  %v4062_v0 = vld [vmem:[#allocation8 + $0x7a4] ss:$16 sps:$4 sm:$0xff]   ;;  %v225_v41 = vrot.slane %v4726_v8, %v224_v37  ;;  %v4125_v37 = vld [vmem:[#allocation8 + $0x4c] ss:$16 sps:$4 sm:$0xff]  }
 0x15b   :  { %2423 = vmatprep.subr.bf16.mxu1 %v4014_v42  ;;  %v4057_v42 = vld [vmem:[#allocation8 + $0x5a0] ss:$16 sps:$4 sm:$0xff]  }
 0x15d   :  { %2383 = vmatpush1.bf16.msra.mxu0 %v4009_v43  ;;  %v217_v43 = vrot.slane %v4726_v8, %v216_v39  ;;  %v4069_v8 = vld [vmem:[#allocation8 + $0x560] ss:$16 sps:$4 sm:$0xff]   ;;  %v4123_v39 = vld [vmem:[#allocation8 + $0x48] ss:$16 sps:$4 sm:$0xff]  }
 0x15e   :  { %2424 = vmatpush1.bf16.msra.mxu1 %v4012_v45  ;;  %2384 = vmatprep.subr.bf16.mxu0 %v4017_v46  ;;  %v4758_v53 = vpop.f32.mrf.mxu0  ;;  %v4761_v56 = vpop.f32.mrf.mxu1  ;;  %v4065_v45 = vld [vmem:[#allocation8 + $0x584] ss:$16 sps:$4 sm:$0xff]  }
 0x15f   :  { %2425 = vmatprep.subr.bf16.mxu1 %v4020_v48  ;;  %v4068_v46 = vld [vmem:[#allocation8 + $0x784] ss:$16 sps:$4 sm:$0xff]   ;;  %v716_v47 = vadd.f32 %v4761_v56, %v225_v41  ;;  %v4063_v48 = vld [vmem:[#allocation8 + $0x580] ss:$16 sps:$4 sm:$0xff]   ;;  %v4134_v41 = vld [vmem:[#allocation8 + $0x22c] ss:$16 sps:$4 sm:$0xff]  }
 0x160   :  { %v676_v57 = vpop.f32.mrf.mxu0  ;;  %v717_v60 = vpop.f32.mrf.mxu1  ;;  %v4080_v56 = vld [vmem:[#allocation8 + $0x744] ss:$16 sps:$4 sm:$0xff]  }
 0x161   :  { %2385 = vmatpush1.bf16.msra.mxu0 %v4015_v49  ;;  %v677_v59 = vadd.f32 %v676_v57, %v221_v50  ;;  %v718_v1 = vadd.f32 %v717_v60, %v229_v54  ;;  %v675_v49 = vadd.f32 %v4758_v53, %v217_v43  ;;  %v4066_v50 = vld [vmem:[#allocation8 + $0x780] ss:$16 sps:$4 sm:$0xff]   ;;  %v4132_v43 = vld [vmem:[#allocation8 + $0x228] ss:$16 sps:$4 sm:$0xff]  }
 0x162   :  { %2426 = vmatpush1.bf16.msra.mxu1 %v4018_v51  ;;  %2386 = vmatprep.subr.bf16.mxu0 %v4023_v52  ;;  %v678_v63 = vpop.f32.mrf.mxu0  ;;  %v719_v3 = vpop.f32.mrf.mxu1  ;;  %v4071_v51 = vld [vmem:[#allocation8 + $0x564] ss:$16 sps:$4 sm:$0xff]   ;;  %v4072_v54 = vld [vmem:[#allocation8 + $0x760] ss:$16 sps:$4 sm:$0xff]  }
 0x163   :  { %2427 = vmatprep.subr.bf16.mxu1 %v4026_v55  ;;  %4413 = vtanh.f32 %v677_v59  ;;  %v4074_v52 = vld [vmem:[#allocation8 + $0x764] ss:$16 sps:$4 sm:$0xff]   ;;  %v4075_v57 = vld [vmem:[#allocation8 + $0x540] ss:$16 sps:$4 sm:$0xff]  }
 0x164   :  { %4415 = vtanh.f32 %v718_v1  ;;  %v679_v4 = vpop.f32.mrf.mxu0  ;;  %v720_v13 = vpop.f32.mrf.mxu1  ;;  %v4077_v55 = vld [vmem:[#allocation8 + $0x544] ss:$16 sps:$4 sm:$0xff]   ;;  %v4078_v53 = vld [vmem:[#allocation8 + $0x740] ss:$16 sps:$4 sm:$0xff]  }
 0x165   :  { %2387 = vmatpush1.bf16.msra.mxu0 %v4021_v58  ;;  %4417 = vtanh.f32 %v716_v47  ;;  %v4083_v58 = vld [vmem:[#allocation8 + $0x524] ss:$16 sps:$4 sm:$0xff]   ;;  %v4081_v60 = vld [vmem:[#allocation8 + $0x520] ss:$16 sps:$4 sm:$0xff]   ;;  %v4095_v4 = vld [vmem:[#allocation8 + $0xec] ss:$16 sps:$4 sm:$0xff]  }
 0x166   :  { %2428 = vmatpush1.bf16.msra.mxu1 %v4024_v61  ;;  %2388 = vmatprep.subr.bf16.mxu0 %v4029_v62  ;;  %4419 = vtanh.f32 %v675_v49  ;;  %v4086_v59 = vld [vmem:[#allocation8 + $0x724] ss:$16 sps:$4 sm:$0xff]   ;;  %v4084_v61 = vld [vmem:[#allocation8 + $0x720] ss:$16 sps:$4 sm:$0xff]   ;;  %v4098_v13 = vld [vmem:[#allocation8 + $0x2ec] ss:$16 sps:$4 sm:$0xff]  }
 0x167   :  { %2429 = vmatprep.subr.bf16.mxu1 %v4032_v2  ;;  %v4089_v62 = vld [vmem:[#allocation8 + $0x504] ss:$16 sps:$4 sm:$0xff]   ;;  %v4087_v1 = vld [vmem:[#allocation8 + $0x500] ss:$16 sps:$4 sm:$0xff]   ;;  %v4138_v47 = vld [vmem:[#allocation8 + $0x208] ss:$16 sps:$4 sm:$0xff]  }
 0x168   :  { %v4092_v63 = vld [vmem:[#allocation8 + $0x704] ss:$16 sps:$4 sm:$0xff]   ;;  %v4090_v3 = vld [vmem:[#allocation8 + $0x700] ss:$16 sps:$4 sm:$0xff]   ;;  %v4146_v49 = vld [vmem:[#allocation8 + $0x3ec] ss:$16 sps:$4 sm:$0xff]  }
 0x169   :  { %2389 = vmatpush1.bf16.msra.mxu0 %v4027_v5 }
 0x16a   :  { %2430 = vmatpush1.bf16.msra.mxu1 %v4030_v14  ;;  %2390 = vmatprep.subr.bf16.mxu0 %v4035_v15  ;;  %v4093_v15 = vld [vmem:[#allocation8 + $0xe8] ss:$16 sps:$4 sm:$0xff]  }
 0x16b   :  { %2431 = vmatprep.subr.bf16.mxu1 %v4038_v16 }
 0x16d   :  { %2391 = vmatpush1.bf16.msra.mxu0 %v4033_v17  ;;  %v4096_v17 = vld [vmem:[#allocation8 + $0x2e8] ss:$16 sps:$4 sm:$0xff]  }
 0x16e   :  { %2432 = vmatpush1.bf16.msra.mxu1 %v4036_v18  ;;  %2392 = vmatprep.subr.bf16.mxu0 %v4041_v19  ;;  %v4101_v18 = vld [vmem:[#allocation8 + $0xcc] ss:$16 sps:$4 sm:$0xff]  }
 0x16f   :  { %2433 = vmatprep.subr.bf16.mxu1 %v4044_v20  ;;  %v4104_v19 = vld [vmem:[#allocation8 + $0x2cc] ss:$16 sps:$4 sm:$0xff]   ;;  %v4099_v20 = vld [vmem:[#allocation8 + $0xc8] ss:$16 sps:$4 sm:$0xff]  }
 0x170   :  { %v4414_v24 = vpop.eup %4413 }
 0x171   :  { %v4416_v25 = vpop.eup %4415  ;;  %2393 = vmatpush1.bf16.msra.mxu0 %v4039_v21  ;;  %v4763_v27 = vpack.c.bf16 %v4414_v24, %v4414_v24  ;;  %v4102_v21 = vld [vmem:[#allocation8 + $0x2c8] ss:$16 sps:$4 sm:$0xff]  }
 0x172   :  { %2434 = vmatpush1.bf16.msra.mxu1 %v4042_v12  ;;  %2394 = vmatprep.subr.bf16.mxu0 %v4047_v22  ;;  %v4765_v30 = vpack.c.bf16 %v4416_v25, %v4416_v25  ;;  %v4418_v2 = vpop.eup %4417  ;;  %v4107_v12 = vld [vmem:[#allocation8 + $0xac] ss:$16 sps:$4 sm:$0xff]   ;;  %v4108_v24 = vld [vmem:[#allocation8 + $0x2a8] ss:$16 sps:$4 sm:$0xff]  }
 0x173   :  { %2435 = vmatprep.subr.bf16.mxu1 %v4050_v23  ;;  %2410 = vmatprep.mubr.bf16.mxu0 %v4763_v27  ;;  %v4420_v5 = vpop.eup %4419  ;;  %v4775_v14 = vpack.c.bf16 %v4418_v2, %v4418_v2  ;;  %v4110_v22 = vld [vmem:[#allocation8 + $0x2ac] ss:$16 sps:$4 sm:$0xff]   ;;  %v4105_v23 = vld [vmem:[#allocation8 + $0xa8] ss:$16 sps:$4 sm:$0xff]  }
 0x174   :  { %2451 = vmatprep.mubr.bf16.mxu1 %v4765_v30  ;;  %v4777_v16 = vpack.c.bf16 %v4420_v5, %v4420_v5  ;;  %v4113_v25 = vld [vmem:[#allocation8 + $0x8c] ss:$16 sps:$4 sm:$0xff]   ;;  %v4165_v2 = vld [vmem:[#allocation8 + $0x168] ss:$16 sps:$4 sm:$0xff]  }
 0x175   :  { %2395 = vmatpush2.bf16.msra.mxu0 %v4045_v26  ;;  %v4116_v26 = vld [vmem:[#allocation8 + $0x28c] ss:$16 sps:$4 sm:$0xff]  }
 0x176   :  { %2436 = vmatpush2.bf16.msra.mxu1 %v4048_v28  ;;  %2396 = vmatprep.subr.bf16.mxu0 %v4053_v29  ;;  %v4111_v28 = vld [vmem:[#allocation8 + $0x88] ss:$16 sps:$4 sm:$0xff]   ;;  %v4119_v29 = vld [vmem:[#allocation8 + $0x6c] ss:$16 sps:$4 sm:$0xff]  }
 0x177   :  { %2437 = vmatprep.subr.bf16.mxu1 %v4056_v31  ;;  %v4122_v31 = vld [vmem:[#allocation8 + $0x26c] ss:$16 sps:$4 sm:$0xff]  }
 0x178   :  { %v4176_v5 = vld [vmem:[#allocation8 + $0x34c] ss:$16 sps:$4 sm:$0xff]  }
 0x179   :  { %2397 = vmatpush2.bf16.msra.mxu0 %v4051_v34  ;;  %v4120_v34 = vld [vmem:[#allocation8 + $0x268] ss:$16 sps:$4 sm:$0xff]  }
 0x17a   :  { %2438 = vmatpush2.bf16.msra.mxu1 %v4054_v38  ;;  %2398 = vmatprep.subr.bf16.mxu0 %v4059_v40  ;;  %v4128_v38 = vld [vmem:[#allocation8 + $0x24c] ss:$16 sps:$4 sm:$0xff]   ;;  %v4126_v40 = vld [vmem:[#allocation8 + $0x248] ss:$16 sps:$4 sm:$0xff]  }
 0x17b   :  { %2439 = vmatprep.subr.bf16.mxu1 %v4062_v0  ;;  %v4131_v0 = vld [vmem:[#allocation8 + $0x2c] ss:$16 sps:$4 sm:$0xff]  }
 0x17d   :  { %2399 = vmatpush2.bf16.msra.mxu0 %v4057_v42  ;;  %v4129_v42 = vld [vmem:[#allocation8 + $0x28] ss:$16 sps:$4 sm:$0xff]  }
 0x17e   :  { %2440 = vmatpush2.bf16.msra.mxu1 %v4060_v44  ;;  %2400 = vmatprep.subr.bf16.mxu0 %v4065_v45  ;;  %v4137_v44 = vld [vmem:[#allocation8 + $0xc] ss:$16 sps:$4 sm:$0xff]  }
 0x17f   :  { %2441 = vmatprep.subr.bf16.mxu1 %v4068_v46  ;;  %v4140_v45 = vld [vmem:[#allocation8 + $0x20c] ss:$16 sps:$4 sm:$0xff]   ;;  %v4135_v46 = vld [vmem:[#allocation8 + $0x8] ss:$16 sps:$4 sm:$0xff]  }
 0x181   :  { %2401 = vmatpush2.bf16.msra.mxu0 %v4063_v48  ;;  %v4143_v48 = vld [vmem:[#allocation8 + $0x1ec] ss:$16 sps:$4 sm:$0xff]  }
 0x182   :  { %2442 = vmatpush2.bf16.msra.mxu1 %v4066_v50  ;;  %2402 = vmatprep.subr.bf16.mxu0 %v4071_v51  ;;  %v4141_v50 = vld [vmem:[#allocation8 + $0x1e8] ss:$16 sps:$4 sm:$0xff]  }
 0x183   :  { %2443 = vmatprep.subr.bf16.mxu1 %v4074_v52  ;;  %v4144_v51 = vld [vmem:[#allocation8 + $0x3e8] ss:$16 sps:$4 sm:$0xff]   ;;  %v4149_v52 = vld [vmem:[#allocation8 + $0x1cc] ss:$16 sps:$4 sm:$0xff]  }
 0x185   :  { %2403 = vmatpush2.bf16.msra.mxu0 %v4069_v8  ;;  %v4152_v8 = vld [vmem:[#allocation8 + $0x3cc] ss:$16 sps:$4 sm:$0xff]  }
 0x186   :  { %2444 = vmatpush2.bf16.msra.mxu1 %v4072_v54  ;;  %2404 = vmatprep.subr.bf16.mxu0 %v4077_v55  ;;  %v4147_v54 = vld [vmem:[#allocation8 + $0x1c8] ss:$16 sps:$4 sm:$0xff]  }
 0x187   :  { %2445 = vmatprep.subr.bf16.mxu1 %v4080_v56  ;;  %v4150_v55 = vld [vmem:[#allocation8 + $0x3c8] ss:$16 sps:$4 sm:$0xff]   ;;  %v4155_v56 = vld [vmem:[#allocation8 + $0x1ac] ss:$16 sps:$4 sm:$0xff]  }
 0x189   :  { %2405 = vmatpush2.bf16.msra.mxu0 %v4075_v57  ;;  %v4158_v57 = vld [vmem:[#allocation8 + $0x3ac] ss:$16 sps:$4 sm:$0xff]  }
 0x18a   :  { %2446 = vmatpush2.bf16.msra.mxu1 %v4078_v53  ;;  %2406 = vmatprep.subr.bf16.mxu0 %v4083_v58  ;;  %v4153_v53 = vld [vmem:[#allocation8 + $0x1a8] ss:$16 sps:$4 sm:$0xff]  }
 0x18b   :  { %2447 = vmatprep.subr.bf16.mxu1 %v4086_v59  ;;  %v4156_v58 = vld [vmem:[#allocation8 + $0x3a8] ss:$16 sps:$4 sm:$0xff]   ;;  %v4161_v59 = vld [vmem:[#allocation8 + $0x18c] ss:$16 sps:$4 sm:$0xff]  }
 0x18d   :  { %2407 = vmatpush2.bf16.msra.mxu0 %v4081_v60  ;;  %v4164_v60 = vld [vmem:[#allocation8 + $0x38c] ss:$16 sps:$4 sm:$0xff]  }
 0x18e   :  { %2448 = vmatpush2.bf16.msra.mxu1 %v4084_v61  ;;  %2408 = vmatprep.subr.bf16.mxu0 %v4089_v62  ;;  %v4159_v61 = vld [vmem:[#allocation8 + $0x188] ss:$16 sps:$4 sm:$0xff]  }
 0x18f   :  { %2449 = vmatprep.subr.bf16.mxu1 %v4092_v63  ;;  %v4162_v62 = vld [vmem:[#allocation8 + $0x388] ss:$16 sps:$4 sm:$0xff]   ;;  %v4167_v63 = vld [vmem:[#allocation8 + $0x16c] ss:$16 sps:$4 sm:$0xff]  }
 0x191   :  { %2409 = vmatpush2.bf16.msra.mxu0 %v4087_v1  ;;  %v4170_v1 = vld [vmem:[#allocation8 + $0x36c] ss:$16 sps:$4 sm:$0xff]  }
 0x192   :  { %2450 = vmatpush2.bf16.msra.mxu1 %v4090_v3  ;;  %2460 = vmatprep.subr.bf16.mxu0 %v4095_v4  ;;  %v4168_v3 = vld [vmem:[#allocation8 + $0x368] ss:$16 sps:$4 sm:$0xff]   ;;  %v4173_v4 = vld [vmem:[#allocation8 + $0x14c] ss:$16 sps:$4 sm:$0xff]  }
 0x193   :  { %2501 = vmatprep.subr.bf16.mxu1 %v4098_v13  ;;  %v4171_v13 = vld [vmem:[#allocation8 + $0x148] ss:$16 sps:$4 sm:$0xff]  }
 0x194   :  { %2411 = vmatmul.mubr.bf16.vlgmr.msra.gmra.mxu0 %v4777_v16 }
 0x195   :  { %2452 = vmatmul.mubr.bf16.vlgmr.msra.gmra.mxu1 %v4775_v14  ;;  %2461 = vmatpush1.bf16.msra.mxu0 %v4093_v15  ;;  %v4174_v15 = vld [vmem:[#allocation8 + $0x348] ss:$16 sps:$4 sm:$0xff]  }
 0x196   :  { %2492 = vmatprep.mubr.bf16.mxu0 %v4745_v33  ;;  %2502 = vmatpush1.bf16.msra.mxu1 %v4096_v17  ;;  %v4114_v33 = vld [vmem:[#allocation8 + $0x288] ss:$16 sps:$4 sm:$0xff]   ;;  %v4179_v17 = vld [vmem:[#allocation8 + $0x12c] ss:$16 sps:$4 sm:$0xff]  }
 0x197   :  { %2533 = vmatprep.mubr.bf16.mxu1 %v4749_v36  ;;  %2462 = vmatprep.subr.bf16.mxu0 %v4101_v18  ;;  %v4117_v36 = vld [vmem:[#allocation8 + $0x68] ss:$16 sps:$4 sm:$0xff]   ;;  %v4182_v18 = vld [vmem:[#allocation8 + $0x32c] ss:$16 sps:$4 sm:$0xff]  }
 0x198   :  { %2503 = vmatprep.subr.bf16.mxu1 %v4104_v19  ;;  %v4177_v19 = vld [vmem:[#allocation8 + $0x128] ss:$16 sps:$4 sm:$0xff]  }
 0x199   :  { %2463 = vmatpush1.bf16.msra.mxu0 %v4099_v20  ;;  %v4180_v20 = vld [vmem:[#allocation8 + $0x328] ss:$16 sps:$4 sm:$0xff]  }
 0x19a   :  { %2504 = vmatpush1.bf16.msra.mxu1 %v4102_v21  ;;  %2464 = vmatprep.subr.bf16.mxu0 %v4107_v12  ;;  %v4185_v21 = vld [vmem:[#allocation8 + $0x10c] ss:$16 sps:$4 sm:$0xff]  }
 0x19b   :  { %2505 = vmatprep.subr.bf16.mxu1 %v4110_v22  ;;  %v4188_v12 = vld [vmem:[#allocation8 + $0x30c] ss:$16 sps:$4 sm:$0xff]   ;;  %v4183_v22 = vld [vmem:[#allocation8 + $0x108] ss:$16 sps:$4 sm:$0xff]  }
 0x19d   :  { %2465 = vmatpush1.bf16.msra.mxu0 %v4105_v23  ;;  %v4186_v23 = vld [vmem:[#allocation8 + $0x308] ss:$16 sps:$4 sm:$0xff]  }
 0x19e   :  { %2506 = vmatpush1.bf16.msra.mxu1 %v4108_v24  ;;  %2466 = vmatprep.subr.bf16.mxu0 %v4113_v25  ;;  %v4191_v24 = vld [vmem:[#allocation8 + $0x4ec] ss:$16 sps:$4 sm:$0xff]  }
 0x19f   :  { %2507 = vmatprep.subr.bf16.mxu1 %v4116_v26  ;;  %v4194_v25 = vld [vmem:[#allocation8 + $0x6ec] ss:$16 sps:$4 sm:$0xff]   ;;  %v4189_v26 = vld [vmem:[#allocation8 + $0x4e8] ss:$16 sps:$4 sm:$0xff]  }
 0x1a1   :  { %2467 = vmatpush1.bf16.msra.mxu0 %v4111_v28  ;;  %v4192_v28 = vld [vmem:[#allocation8 + $0x6e8] ss:$16 sps:$4 sm:$0xff]  }
 0x1a2   :  { %2508 = vmatpush1.bf16.msra.mxu1 %v4114_v33  ;;  %2468 = vmatprep.subr.bf16.mxu0 %v4119_v29  ;;  %v4197_v33 = vld [vmem:[#allocation8 + $0x4cc] ss:$16 sps:$4 sm:$0xff]  }
 0x1a3   :  { %2509 = vmatprep.subr.bf16.mxu1 %v4122_v31  ;;  %v4200_v29 = vld [vmem:[#allocation8 + $0x6cc] ss:$16 sps:$4 sm:$0xff]   ;;  %v4195_v31 = vld [vmem:[#allocation8 + $0x4c8] ss:$16 sps:$4 sm:$0xff]  }
 0x1a5   :  { %2469 = vmatpush1.bf16.msra.mxu0 %v4117_v36  ;;  %v4198_v36 = vld [vmem:[#allocation8 + $0x6c8] ss:$16 sps:$4 sm:$0xff]  }
 0x1a6   :  { %2510 = vmatpush1.bf16.msra.mxu1 %v4120_v34  ;;  %2470 = vmatprep.subr.bf16.mxu0 %v4125_v37  ;;  %v4203_v34 = vld [vmem:[#allocation8 + $0x4ac] ss:$16 sps:$4 sm:$0xff]  }
 0x1a7   :  { %2511 = vmatprep.subr.bf16.mxu1 %v4128_v38  ;;  %v4206_v37 = vld [vmem:[#allocation8 + $0x6ac] ss:$16 sps:$4 sm:$0xff]   ;;  %v4201_v38 = vld [vmem:[#allocation8 + $0x4a8] ss:$16 sps:$4 sm:$0xff]  }
 0x1a9   :  { %2471 = vmatpush1.bf16.msra.mxu0 %v4123_v39  ;;  %v4209_v39 = vld [vmem:[#allocation8 + $0x48c] ss:$16 sps:$4 sm:$0xff]  }
 0x1aa   :  { %2512 = vmatpush1.bf16.msra.mxu1 %v4126_v40  ;;  %2472 = vmatprep.subr.bf16.mxu0 %v4131_v0  ;;  %v4207_v40 = vld [vmem:[#allocation8 + $0x488] ss:$16 sps:$4 sm:$0xff]   ;;  %v4215_v0 = vld [vmem:[#allocation8 + $0x46c] ss:$16 sps:$4 sm:$0xff]  }
 0x1ab   :  { %2513 = vmatprep.subr.bf16.mxu1 %v4134_v41  ;;  %v4218_v41 = vld [vmem:[#allocation8 + $0x66c] ss:$16 sps:$4 sm:$0xff]  }
 0x1ad   :  { %2473 = vmatpush1.bf16.msra.mxu0 %v4129_v42  ;;  %v4216_v42 = vld [vmem:[#allocation8 + $0x668] ss:$16 sps:$4 sm:$0xff]  }
 0x1ae   :  { %2514 = vmatpush1.bf16.msra.mxu1 %v4132_v43  ;;  %2474 = vmatprep.subr.bf16.mxu0 %v4137_v44  ;;  %v4221_v43 = vld [vmem:[#allocation8 + $0x44c] ss:$16 sps:$4 sm:$0xff]  }
 0x1af   :  { %2515 = vmatprep.subr.bf16.mxu1 %v4140_v45  ;;  %v4224_v44 = vld [vmem:[#allocation8 + $0x64c] ss:$16 sps:$4 sm:$0xff]   ;;  %v4219_v45 = vld [vmem:[#allocation8 + $0x448] ss:$16 sps:$4 sm:$0xff]  }
 0x1b1   :  { %2475 = vmatpush1.bf16.msra.mxu0 %v4135_v46  ;;  %v4222_v46 = vld [vmem:[#allocation8 + $0x648] ss:$16 sps:$4 sm:$0xff]  }
 0x1b2   :  { %2516 = vmatpush1.bf16.msra.mxu1 %v4138_v47  ;;  %2476 = vmatprep.subr.bf16.mxu0 %v4143_v48  ;;  %v4227_v47 = vld [vmem:[#allocation8 + $0x42c] ss:$16 sps:$4 sm:$0xff]  }
 0x1b3   :  { %2517 = vmatprep.subr.bf16.mxu1 %v4146_v49  ;;  %v4230_v48 = vld [vmem:[#allocation8 + $0x62c] ss:$16 sps:$4 sm:$0xff]   ;;  %v4225_v49 = vld [vmem:[#allocation8 + $0x428] ss:$16 sps:$4 sm:$0xff]  }
 0x1b5   :  { %2477 = vmatpush2.bf16.msra.mxu0 %v4141_v50  ;;  %v4228_v50 = vld [vmem:[#allocation8 + $0x628] ss:$16 sps:$4 sm:$0xff]  }
 0x1b6   :  { %2518 = vmatpush2.bf16.msra.mxu1 %v4144_v51  ;;  %2478 = vmatprep.subr.bf16.mxu0 %v4149_v52  ;;  %v4233_v51 = vld [vmem:[#allocation8 + $0x40c] ss:$16 sps:$4 sm:$0xff]  }
 0x1b7   :  { %2519 = vmatprep.subr.bf16.mxu1 %v4152_v8  ;;  %v4236_v52 = vld [vmem:[#allocation8 + $0x60c] ss:$16 sps:$4 sm:$0xff]   ;;  %v4231_v8 = vld [vmem:[#allocation8 + $0x408] ss:$16 sps:$4 sm:$0xff]  }
 0x1b9   :  { %2479 = vmatpush2.bf16.msra.mxu0 %v4147_v54  ;;  %v4234_v54 = vld [vmem:[#allocation8 + $0x608] ss:$16 sps:$4 sm:$0xff]  }
 0x1ba   :  { %2520 = vmatpush2.bf16.msra.mxu1 %v4150_v55  ;;  %2480 = vmatprep.subr.bf16.mxu0 %v4155_v56  ;;  %v4239_v55 = vld [vmem:[#allocation8 + $0x5ec] ss:$16 sps:$4 sm:$0xff]  }
 0x1bb   :  { %2521 = vmatprep.subr.bf16.mxu1 %v4158_v57  ;;  %v4242_v56 = vld [vmem:[#allocation8 + $0x7ec] ss:$16 sps:$4 sm:$0xff]   ;;  %v4237_v57 = vld [vmem:[#allocation8 + $0x5e8] ss:$16 sps:$4 sm:$0xff]  }
 0x1bd   :  { %2481 = vmatpush2.bf16.msra.mxu0 %v4153_v53  ;;  %v4240_v53 = vld [vmem:[#allocation8 + $0x7e8] ss:$16 sps:$4 sm:$0xff]  }
 0x1be   :  { %2522 = vmatpush2.bf16.msra.mxu1 %v4156_v58  ;;  %2482 = vmatprep.subr.bf16.mxu0 %v4161_v59  ;;  %v4245_v58 = vld [vmem:[#allocation8 + $0x5cc] ss:$16 sps:$4 sm:$0xff]  }
 0x1bf   :  { %2523 = vmatprep.subr.bf16.mxu1 %v4164_v60  ;;  %v4248_v59 = vld [vmem:[#allocation8 + $0x7cc] ss:$16 sps:$4 sm:$0xff]   ;;  %v4243_v60 = vld [vmem:[#allocation8 + $0x5c8] ss:$16 sps:$4 sm:$0xff]  }
 0x1c1   :  { %2483 = vmatpush2.bf16.msra.mxu0 %v4159_v61  ;;  %v4246_v61 = vld [vmem:[#allocation8 + $0x7c8] ss:$16 sps:$4 sm:$0xff]  }
 0x1c2   :  { %2524 = vmatpush2.bf16.msra.mxu1 %v4162_v62  ;;  %2484 = vmatprep.subr.bf16.mxu0 %v4167_v63  ;;  %v4251_v62 = vld [vmem:[#allocation8 + $0x5ac] ss:$16 sps:$4 sm:$0xff]  }
 0x1c3   :  { %2525 = vmatprep.subr.bf16.mxu1 %v4170_v1  ;;  %v4254_v63 = vld [vmem:[#allocation8 + $0x7ac] ss:$16 sps:$4 sm:$0xff]   ;;  %v4249_v1 = vld [vmem:[#allocation8 + $0x5a8] ss:$16 sps:$4 sm:$0xff]  }
 0x1c5   :  { %2485 = vmatpush2.bf16.msra.mxu0 %v4165_v2  ;;  %v4252_v2 = vld [vmem:[#allocation8 + $0x7a8] ss:$16 sps:$4 sm:$0xff]  }
 0x1c6   :  { %2526 = vmatpush2.bf16.msra.mxu1 %v4168_v3  ;;  %2486 = vmatprep.subr.bf16.mxu0 %v4173_v4  ;;  %v4257_v3 = vld [vmem:[#allocation8 + $0x58c] ss:$16 sps:$4 sm:$0xff]  }
 0x1c7   :  { %2527 = vmatprep.subr.bf16.mxu1 %v4176_v5  ;;  %v4260_v4 = vld [vmem:[#allocation8 + $0x78c] ss:$16 sps:$4 sm:$0xff]   ;;  %v4255_v5 = vld [vmem:[#allocation8 + $0x588] ss:$16 sps:$4 sm:$0xff]  }
 0x1c9   :  { %2487 = vmatpush2.bf16.msra.mxu0 %v4171_v13  ;;  %v4258_v13 = vld [vmem:[#allocation8 + $0x788] ss:$16 sps:$4 sm:$0xff]  }
 0x1ca   :  { %2528 = vmatpush2.bf16.msra.mxu1 %v4174_v15  ;;  %2488 = vmatprep.subr.bf16.mxu0 %v4179_v17  ;;  %v4263_v15 = vld [vmem:[#allocation8 + $0x56c] ss:$16 sps:$4 sm:$0xff]  }
 0x1cb   :  { %2529 = vmatprep.subr.bf16.mxu1 %v4182_v18  ;;  %v4266_v17 = vld [vmem:[#allocation8 + $0x76c] ss:$16 sps:$4 sm:$0xff]   ;;  %v4261_v18 = vld [vmem:[#allocation8 + $0x568] ss:$16 sps:$4 sm:$0xff]  }
 0x1cd   :  { %2489 = vmatpush2.bf16.msra.mxu0 %v4177_v19  ;;  %v4264_v19 = vld [vmem:[#allocation8 + $0x768] ss:$16 sps:$4 sm:$0xff]  }
 0x1ce   :  { %2530 = vmatpush2.bf16.msra.mxu1 %v4180_v20  ;;  %2490 = vmatprep.subr.bf16.mxu0 %v4185_v21  ;;  %v4269_v20 = vld [vmem:[#allocation8 + $0x54c] ss:$16 sps:$4 sm:$0xff]  }
 0x1cf   :  { %2531 = vmatprep.subr.bf16.mxu1 %v4188_v12  ;;  %v4272_v21 = vld [vmem:[#allocation8 + $0x74c] ss:$16 sps:$4 sm:$0xff]   ;;  %v4267_v12 = vld [vmem:[#allocation8 + $0x548] ss:$16 sps:$4 sm:$0xff]  }
 0x1d1   :  { %2491 = vmatpush2.bf16.msra.mxu0 %v4183_v22  ;;  %v4270_v22 = vld [vmem:[#allocation8 + $0x748] ss:$16 sps:$4 sm:$0xff]  }
 0x1d2   :  { %2532 = vmatpush2.bf16.msra.mxu1 %v4186_v23  ;;  %2542 = vmatprep.subr.bf16.mxu0 %v4191_v24  ;;  %v4275_v23 = vld [vmem:[#allocation8 + $0x52c] ss:$16 sps:$4 sm:$0xff]  }
 0x1d3   :  { %2583 = vmatprep.subr.bf16.mxu1 %v4194_v25  ;;  %v4278_v24 = vld [vmem:[#allocation8 + $0x72c] ss:$16 sps:$4 sm:$0xff]   ;;  %v4273_v25 = vld [vmem:[#allocation8 + $0x528] ss:$16 sps:$4 sm:$0xff]  }
 0x1d4   :  { %2493 = vmatmul.mubr.bf16.vlgmr.msra.gmra.mxu0 %v4747_v35  ;;  %v4204_v35 = vld [vmem:[#allocation8 + $0x6a8] ss:$16 sps:$4 sm:$0xff]  }
 0x1d5   :  { %2534 = vmatmul.mubr.bf16.vlgmr.msra.gmra.mxu1 %v4743_v32  ;;  %2543 = vmatpush1.bf16.msra.mxu0 %v4189_v26  ;;  %v4212_v32 = vld [vmem:[#allocation8 + $0x68c] ss:$16 sps:$4 sm:$0xff]   ;;  %v4276_v26 = vld [vmem:[#allocation8 + $0x728] ss:$16 sps:$4 sm:$0xff]  }
 0x1d6   :  { %2574 = vmatprep.mubr.bf16.mxu0 %v4763_v27  ;;  %2584 = vmatpush1.bf16.msra.mxu1 %v4192_v28  ;;  %v4210_v27 = vld [vmem:[#allocation8 + $0x688] ss:$16 sps:$4 sm:$0xff]   ;;  %v4281_v28 = vld [vmem:[#allocation8 + $0x50c] ss:$16 sps:$4 sm:$0xff]  }
 0x1d7   :  { %2615 = vmatprep.mubr.bf16.mxu1 %v4765_v30  ;;  %2544 = vmatprep.subr.bf16.mxu0 %v4197_v33  ;;  %v4213_v30 = vld [vmem:[#allocation8 + $0x468] ss:$16 sps:$4 sm:$0xff]   ;;  %v4284_v33 = vld [vmem:[#allocation8 + $0x70c] ss:$16 sps:$4 sm:$0xff]  }
 0x1d8   :  { %2585 = vmatprep.subr.bf16.mxu1 %v4200_v29  ;;  %v4279_v29 = vld [vmem:[#allocation8 + $0x508] ss:$16 sps:$4 sm:$0xff]  }
 0x1d9   :  { %2545 = vmatpush1.bf16.msra.mxu0 %v4195_v31  ;;  %v4282_v31 = vld [vmem:[#allocation8 + $0x708] ss:$16 sps:$4 sm:$0xff]  }
 0x1da   :  { %2586 = vmatpush1.bf16.msra.mxu1 %v4198_v36  ;;  %2546 = vmatprep.subr.bf16.mxu0 %v4203_v34  ;;  %v4287_v36 = vld [vmem:[#allocation10 + $0x74] ss:$8 sps:$4 sm:$0xff]   ;;  %v4285_v34 = vld [vmem:[#allocation10 + $0x70] ss:$8 sps:$4 sm:$0xff]  }
 0x1db   :  { %2587 = vmatprep.subr.bf16.mxu1 %v4206_v37  ;;  %v4290_v37 = vld [vmem:[#allocation10 + $0x64] ss:$8 sps:$4 sm:$0xff]  }
 0x1dd   :  { %2547 = vmatpush1.bf16.msra.mxu0 %v4201_v38 }
 0x1de   :  { %2588 = vmatpush1.bf16.msra.mxu1 %v4204_v35  ;;  %2548 = vmatprep.subr.bf16.mxu0 %v4209_v39  ;;  %v4288_v39 = vld [vmem:[#allocation10 + $0x60] ss:$8 sps:$4 sm:$0xff]  }
 0x1df   :  { %2589 = vmatprep.subr.bf16.mxu1 %v4212_v32 }
 0x1e1   :  { %2549 = vmatpush1.bf16.msra.mxu0 %v4207_v40  ;;  %v4293_v40 = vld [vmem:[#allocation10 + $0x54] ss:$8 sps:$4 sm:$0xff]  }
 0x1e2   :  { %2590 = vmatpush1.bf16.msra.mxu1 %v4210_v27  ;;  %2550 = vmatprep.subr.bf16.mxu0 %v4215_v0 }
 0x1e3   :  { %2591 = vmatprep.subr.bf16.mxu1 %v4218_v41 }
 0x1e5   :  { %2551 = vmatpush1.bf16.msra.mxu0 %v4213_v30  ;;  %v4291_v30 = vld [vmem:[#allocation10 + $0x50] ss:$8 sps:$4 sm:$0xff]  }
 0x1e6   :  { %2592 = vmatpush1.bf16.msra.mxu1 %v4216_v42  ;;  %2552 = vmatprep.subr.bf16.mxu0 %v4221_v43 }
 0x1e7   :  { %2593 = vmatprep.subr.bf16.mxu1 %v4224_v44  ;;  %v4333_v44 = vld [vmem:[#allocation10 + $0x170] ss:$8 sps:$4 sm:$0xff]  }
 0x1e9   :  { %2553 = vmatpush1.bf16.msra.mxu0 %v4219_v45  ;;  %v4338_v45 = vld [vmem:[#allocation10 + $0x164] ss:$8 sps:$4 sm:$0xff]  }
 0x1ea   :  { %2594 = vmatpush1.bf16.msra.mxu1 %v4222_v46  ;;  %2554 = vmatprep.subr.bf16.mxu0 %v4227_v47  ;;  %v4294_v46 = vld [vmem:[#allocation10 + $0x40] ss:$8 sps:$4 sm:$0xff]   ;;  %v4299_v47 = vld [vmem:[#allocation10 + $0x34] ss:$8 sps:$4 sm:$0xff]  }
 0x1eb   :  { %2595 = vmatprep.subr.bf16.mxu1 %v4230_v48  ;;  %v4336_v48 = vld [vmem:[#allocation10 + $0x160] ss:$8 sps:$4 sm:$0xff]  }
 0x1ed   :  { %2555 = vmatpush1.bf16.msra.mxu0 %v4225_v49  ;;  %v4341_v49 = vld [vmem:[#allocation10 + $0x154] ss:$8 sps:$4 sm:$0xff]  }
 0x1ee   :  { %2596 = vmatpush1.bf16.msra.mxu1 %v4228_v50  ;;  %2556 = vmatprep.subr.bf16.mxu0 %v4233_v51  ;;  %v4297_v50 = vld [vmem:[#allocation10 + $0x30] ss:$8 sps:$4 sm:$0xff]   ;;  %v4302_v51 = vld [vmem:[#allocation10 + $0x24] ss:$8 sps:$4 sm:$0xff]  }
 0x1ef   :  { %2597 = vmatprep.subr.bf16.mxu1 %v4236_v52  ;;  %v4339_v52 = vld [vmem:[#allocation10 + $0x150] ss:$8 sps:$4 sm:$0xff]  }
 0x1f1   :  { %2557 = vmatpush1.bf16.msra.mxu0 %v4231_v8  ;;  %v4344_v8 = vld [vmem:[#allocation10 + $0x144] ss:$8 sps:$4 sm:$0xff]  }
 0x1f2   :  { %2598 = vmatpush1.bf16.msra.mxu1 %v4234_v54  ;;  %2558 = vmatprep.subr.bf16.mxu0 %v4239_v55  ;;  %v4300_v54 = vld [vmem:[#allocation10 + $0x20] ss:$8 sps:$4 sm:$0xff]   ;;  %v4305_v55 = vld [vmem:[#allocation10 + $0x14] ss:$8 sps:$4 sm:$0xff]  }
 0x1f3   :  { %2599 = vmatprep.subr.bf16.mxu1 %v4242_v56  ;;  %v4342_v56 = vld [vmem:[#allocation10 + $0x140] ss:$8 sps:$4 sm:$0xff]  }
 0x1f5   :  { %2559 = vmatpush2.bf16.msra.mxu0 %v4237_v57  ;;  %v4347_v57 = vld [vmem:[#allocation10 + $0x134] ss:$8 sps:$4 sm:$0xff]  }
 0x1f6   :  { %2600 = vmatpush2.bf16.msra.mxu1 %v4240_v53  ;;  %2560 = vmatprep.subr.bf16.mxu0 %v4245_v58  ;;  %v4303_v53 = vld [vmem:[#allocation10 + $0x10] ss:$8 sps:$4 sm:$0xff]   ;;  %v4308_v58 = vld [vmem:[#allocation10 + $0x4] ss:$8 sps:$4 sm:$0xff]  }
 0x1f7   :  { %2601 = vmatprep.subr.bf16.mxu1 %v4248_v59  ;;  %v4345_v59 = vld [vmem:[#allocation10 + $0x130] ss:$8 sps:$4 sm:$0xff]  }
 0x1f9   :  { %2561 = vmatpush2.bf16.msra.mxu0 %v4243_v60  ;;  %v4350_v60 = vld [vmem:[#allocation10 + $0x124] ss:$8 sps:$4 sm:$0xff]  }
 0x1fa   :  { %2602 = vmatpush2.bf16.msra.mxu1 %v4246_v61  ;;  %2562 = vmatprep.subr.bf16.mxu0 %v4251_v62  ;;  %v4306_v61 = vld [vmem:[#allocation10] ss:$8 sps:$4 sm:$0xff]   ;;  %v4311_v62 = vld [vmem:[#allocation10 + $0xf4] ss:$8 sps:$4 sm:$0xff]  }
 0x1fb   :  { %2603 = vmatprep.subr.bf16.mxu1 %v4254_v63  ;;  %v4348_v63 = vld [vmem:[#allocation10 + $0x120] ss:$8 sps:$4 sm:$0xff]  }
 0x1fd   :  { %2563 = vmatpush2.bf16.msra.mxu0 %v4249_v1  ;;  %v4353_v1 = vld [vmem:[#allocation10 + $0x114] ss:$8 sps:$4 sm:$0xff]  }
 0x1fe   :  { %2604 = vmatpush2.bf16.msra.mxu1 %v4252_v2  ;;  %2564 = vmatprep.subr.bf16.mxu0 %v4257_v3  ;;  %v4309_v2 = vld [vmem:[#allocation10 + $0xf0] ss:$8 sps:$4 sm:$0xff]   ;;  %v4314_v3 = vld [vmem:[#allocation10 + $0xe4] ss:$8 sps:$4 sm:$0xff]  }
 0x1ff   :  { %2605 = vmatprep.subr.bf16.mxu1 %v4260_v4  ;;  %v4351_v4 = vld [vmem:[#allocation10 + $0x110] ss:$8 sps:$4 sm:$0xff]  }
 0x201   :  { %2565 = vmatpush2.bf16.msra.mxu0 %v4255_v5  ;;  %v4356_v5 = vld [vmem:[#allocation10 + $0x104] ss:$8 sps:$4 sm:$0xff]  }
 0x202   :  { %2606 = vmatpush2.bf16.msra.mxu1 %v4258_v13  ;;  %2566 = vmatprep.subr.bf16.mxu0 %v4263_v15  ;;  %v4312_v13 = vld [vmem:[#allocation10 + $0xe0] ss:$8 sps:$4 sm:$0xff]   ;;  %v4317_v15 = vld [vmem:[#allocation10 + $0xd4] ss:$8 sps:$4 sm:$0xff]  }
 0x203   :  { %2607 = vmatprep.subr.bf16.mxu1 %v4266_v17  ;;  %v4354_v17 = vld [vmem:[#allocation10 + $0x100] ss:$8 sps:$4 sm:$0xff]  }
 0x205   :  { %2567 = vmatpush2.bf16.msra.mxu0 %v4261_v18  ;;  %v4359_v18 = vld [vmem:[#allocation10 + $0x1f4] ss:$8 sps:$4 sm:$0xff]  }
 0x206   :  { %2608 = vmatpush2.bf16.msra.mxu1 %v4264_v19  ;;  %2568 = vmatprep.subr.bf16.mxu0 %v4269_v20  ;;  %v4315_v19 = vld [vmem:[#allocation10 + $0xd0] ss:$8 sps:$4 sm:$0xff]   ;;  %v4320_v20 = vld [vmem:[#allocation10 + $0xc4] ss:$8 sps:$4 sm:$0xff]  }
 0x207   :  { %2609 = vmatprep.subr.bf16.mxu1 %v4272_v21  ;;  %v4357_v21 = vld [vmem:[#allocation10 + $0x1f0] ss:$8 sps:$4 sm:$0xff]  }
 0x209   :  { %2569 = vmatpush2.bf16.msra.mxu0 %v4267_v12  ;;  %v4362_v12 = vld [vmem:[#allocation10 + $0x1e4] ss:$8 sps:$4 sm:$0xff]  }
 0x20a   :  { %2610 = vmatpush2.bf16.msra.mxu1 %v4270_v22  ;;  %2570 = vmatprep.subr.bf16.mxu0 %v4275_v23  ;;  %v4318_v22 = vld [vmem:[#allocation10 + $0xc0] ss:$8 sps:$4 sm:$0xff]   ;;  %v4323_v23 = vld [vmem:[#allocation10 + $0xb4] ss:$8 sps:$4 sm:$0xff]  }
 0x20b   :  { %2611 = vmatprep.subr.bf16.mxu1 %v4278_v24  ;;  %v4360_v24 = vld [vmem:[#allocation10 + $0x1e0] ss:$8 sps:$4 sm:$0xff]  }
 0x20d   :  { %2571 = vmatpush2.bf16.msra.mxu0 %v4273_v25  ;;  %v4321_v25 = vld [vmem:[#allocation10 + $0xb0] ss:$8 sps:$4 sm:$0xff]  }
 0x20e   :  { %2612 = vmatpush2.bf16.msra.mxu1 %v4276_v26  ;;  %2572 = vmatprep.subr.bf16.mxu0 %v4281_v28  ;;  %v4326_v26 = vld [vmem:[#allocation10 + $0xa4] ss:$8 sps:$4 sm:$0xff]   ;;  %v4324_v28 = vld [vmem:[#allocation10 + $0xa0] ss:$8 sps:$4 sm:$0xff]  }
 0x20f   :  { %2613 = vmatprep.subr.bf16.mxu1 %v4284_v33  ;;  %v4329_v33 = vld [vmem:[#allocation10 + $0x94] ss:$8 sps:$4 sm:$0xff]  }
 0x211   :  { %2573 = vmatpush2.bf16.msra.mxu0 %v4279_v29  ;;  %v4800_v29 = vld [vmem:[%s4834_s4] sm:$0xf] }
 0x212   :  { %2614 = vmatpush2.bf16.msra.mxu1 %v4282_v31  ;;  %3028 = vmatprep.subr.bf16.mxu0 %v4287_v36  ;;  %v4327_v31 = vld [vmem:[#allocation10 + $0x90] ss:$8 sps:$4 sm:$0xff]   ;;  %v4332_v36 = vld [vmem:[#allocation10 + $0x84] ss:$8 sps:$4 sm:$0xff]  }
 0x214   :  { %2575 = vmatmul.mubr.bf16.vlgmr.msra.gmra.mxu0 %v4777_v16  ;;  %v4788_v38 = vpop.f32.mrf.mxu0  ;;  %v4296_v16 = vld [vmem:[#allocation10 + $0x44] ss:$8 sps:$4 sm:$0xff]  }
 0x215   :  { %2616 = vmatmul.mubr.bf16.vlgmr.msra.gmra.mxu1 %v4775_v14  ;;  %v4791_v35 = vpop.f32.mrf.mxu1  ;;  %3029 = vmatpush1.bf16.msra.mxu0 %v4285_v34  ;;  %v4335_v14 = vld [vmem:[#allocation10 + $0x174] ss:$8 sps:$4 sm:$0xff]   ;;  %v999_v34 = vrot.slane %v4800_v29, %v4724_v7 }
 0x216   :  { %v4793_v32 = vpop.f32.mrf.mxu0  ;;  %3030 = vmatprep.subr.bf16.mxu0 %v4290_v37  ;;  %3069 = vmatprep.subr.bf16.mxu1 %v4335_v14  ;;  %v1003_v37 = vrot.slane %v4800_v29, %v4730_v10  ;;  %v4363_v14 = vld [vmem:[#allocation10 + $0x1d0] ss:$8 sps:$4 sm:$0xff]  }
 0x217   :  { %v4795_v27 = vpop.f32.mrf.mxu1  ;;  %3070 = vmatpush1.bf16.msra.mxu1 %v4333_v44 }
 0x218   :  { %v2334_v0 = vpop.f32.mrf.mxu0  ;;  %3071 = vmatprep.subr.bf16.mxu1 %v4338_v45 }
 0x219   :  { %v2375_v41 = vpop.f32.mrf.mxu1  ;;  %3031 = vmatpush1.bf16.msra.mxu0 %v4288_v39  ;;  %v4330_v39 = vld [vmem:[#allocation10 + $0x80] ss:$8 sps:$4 sm:$0xff]   ;;  %v2333_v0 = vadd.f32 %v4793_v32, %v1003_v37 }
 0x21a   :  { %v2335_v42 = vpop.f32.mrf.mxu0  ;;  %3032 = vmatprep.subr.bf16.mxu0 %v4293_v40  ;;  %v2331_v40 = vadd.f32 %v4788_v38, %v999_v34  ;;  %v4368_v38 = vld [vmem:[#allocation10 + $0x1c4] ss:$8 sps:$4 sm:$0xff]  }
 0x21b   :  { %v2376_v43 = vpop.f32.mrf.mxu1  ;;  %3072 = vmatpush1.bf16.msra.mxu1 %v4336_v48  ;;  %v4365_v42 = vld [vmem:[#allocation10 + $0x1d4] ss:$8 sps:$4 sm:$0xff]  }
 0x21c   :  { %3073 = vmatprep.subr.bf16.mxu1 %v4341_v49  ;;  %v2372_v41 = vadd.f32 %v4791_v35, %v2331_v40 }
 0x21d   :  { %3033 = vmatpush1.bf16.msra.mxu0 %v4291_v30 }
 0x21e   :  { %3034 = vmatprep.subr.bf16.mxu0 %v4296_v16  ;;  %v2374_v16 = vadd.f32 %v4795_v27, %v2333_v0  ;;  %v4371_v27 = vld [vmem:[#allocation10 + $0x1b4] ss:$8 sps:$4 sm:$0xff]  }
 0x21f   :  { %3074 = vmatpush1.bf16.msra.mxu1 %v4339_v52 }
 0x220   :  { %3075 = vmatprep.subr.bf16.mxu1 %v4344_v8  ;;  %v4369_v8 = vld [vmem:[#allocation10 + $0x1b0] ss:$8 sps:$4 sm:$0xff]  }
 0x221   :  { %3035 = vmatpush1.bf16.msra.mxu0 %v4294_v46 }
 0x222   :  { %3036 = vmatprep.subr.bf16.mxu0 %v4299_v47 }
 0x223   :  { %3076 = vmatpush1.bf16.msra.mxu1 %v4342_v56  ;;  %v4377_v56 = vld [vmem:[#allocation10 + $0x194] ss:$8 sps:$4 sm:$0xff]  }
 0x224   :  { %3077 = vmatprep.subr.bf16.mxu1 %v4347_v57  ;;  %v4375_v57 = vld [vmem:[#allocation10 + $0x190] ss:$8 sps:$4 sm:$0xff]  }
 0x225   :  { %3037 = vmatpush1.bf16.msra.mxu0 %v4297_v50 }
 0x226   :  { %3038 = vmatprep.subr.bf16.mxu0 %v4302_v51  ;;  %v4366_v51 = vld [vmem:[#allocation10 + $0x1c0] ss:$8 sps:$4 sm:$0xff]  }
 0x227   :  { %3078 = vmatpush1.bf16.msra.mxu1 %v4345_v59  ;;  %v4380_v59 = vld [vmem:[#allocation10 + $0x184] ss:$8 sps:$4 sm:$0xff]  }
 0x228   :  { %3079 = vmatprep.subr.bf16.mxu1 %v4350_v60 }
 0x229   :  { %3039 = vmatpush1.bf16.msra.mxu0 %v4300_v54  ;;  %v4374_v54 = vld [vmem:[#allocation10 + $0x1a4] ss:$8 sps:$4 sm:$0xff]  }
 0x22a   :  { %3040 = vmatprep.subr.bf16.mxu0 %v4305_v55  ;;  %v4372_v55 = vld [vmem:[#allocation10 + $0x1a0] ss:$8 sps:$4 sm:$0xff]  }
 0x22b   :  { %3080 = vmatpush1.bf16.msra.mxu1 %v4348_v63 }
 0x22c   :  { %3081 = vmatprep.subr.bf16.mxu1 %v4353_v1 }
 0x22d   :  { %3041 = vmatpush1.bf16.msra.mxu0 %v4303_v53 }
 0x22e   :  { %3042 = vmatprep.subr.bf16.mxu0 %v4308_v58  ;;  %v4378_v58 = vld [vmem:[#allocation10 + $0x180] ss:$8 sps:$4 sm:$0xff]  }
 0x22f   :  { %3082 = vmatpush1.bf16.msra.mxu1 %v4351_v4 }
 0x230   :  { %3083 = vmatprep.subr.bf16.mxu1 %v4356_v5 }
 0x231   :  { %3043 = vmatpush1.bf16.msra.mxu0 %v4306_v61 }
 0x232   :  { %3044 = vmatprep.subr.bf16.mxu0 %v4311_v62 }
 0x233   :  { %3084 = vmatpush1.bf16.msra.mxu1 %v4354_v17  ;;  %v4381_v17 = vld [vmem:[#allocation11 + $0x78] sm:$0xff]  }
 0x234   :  { %3085 = vmatprep.subr.bf16.mxu1 %v4359_v18  ;;  %v4382_v18 = vld [vmem:[#allocation11 + $0x38] sm:$0xff]  }
 0x235   :  { %3045 = vmatpush2.bf16.msra.mxu0 %v4309_v2 }
 0x236   :  { %3046 = vmatprep.subr.bf16.mxu0 %v4314_v3 }
 0x237   :  { %3086 = vmatpush2.bf16.msra.mxu1 %v4357_v21  ;;  %v4385_v21 = vld [vmem:[#allocation11 + $0x68] sm:$0xff]  }
 0x238   :  { %3087 = vmatprep.subr.bf16.mxu1 %v4362_v12  ;;  %v4386_v12 = vld [vmem:[#allocation11 + $0x28] sm:$0xff]  }
 0x239   :  { %3047 = vmatpush2.bf16.msra.mxu0 %v4312_v13 }
 0x23a   :  { %3048 = vmatprep.subr.bf16.mxu0 %v4317_v15 }
 0x23b   :  { %3088 = vmatpush2.bf16.msra.mxu1 %v4360_v24 }
 0x23c   :  { %3089 = vmatprep.subr.bf16.mxu1 %v4365_v42 }
 0x23d   :  { %3049 = vmatpush2.bf16.msra.mxu0 %v4315_v19  ;;  %v4383_v19 = vld [vmem:[#allocation11 + $0x70] sm:$0xff]  }
 0x23e   :  { %3050 = vmatprep.subr.bf16.mxu0 %v4320_v20  ;;  %v4384_v20 = vld [vmem:[#allocation11 + $0x30] sm:$0xff]  }
 0x23f   :  { %3090 = vmatpush2.bf16.msra.mxu1 %v4363_v14  ;;  %v4387_v14 = vld [vmem:[#allocation11 + $0x60] sm:$0xff]  }
 0x240   :  { %3091 = vmatprep.subr.bf16.mxu1 %v4368_v38  ;;  %v4391_v38 = vld [vmem:[#allocation11 + $0x50] sm:$0xff]  }
 0x241   :  { %3051 = vmatpush2.bf16.msra.mxu0 %v4318_v22  ;;  %v1007_v22 = vrot.slane %v4800_v29, %v208_v9 }
 0x242   :  { %3052 = vmatprep.subr.bf16.mxu0 %v4323_v23  ;;  %v1011_v23 = vrot.slane %v4800_v29, %v212_v11 }
 0x243   :  { %3092 = vmatpush2.bf16.msra.mxu1 %v4366_v51  ;;  %v4394_v51 = vld [vmem:[#allocation11 + $0x8] sm:$0xff]  }
 0x244   :  { %3093 = vmatprep.subr.bf16.mxu1 %v4371_v27  ;;  %v4397_v27 = vld [vmem:[#allocation13 + $0x38] sm:$0xff]  }
 0x245   :  { %3053 = vmatpush2.bf16.msra.mxu0 %v4321_v25 }
 0x246   :  { %3054 = vmatprep.subr.bf16.mxu0 %v4326_v26 }
 0x247   :  { %3094 = vmatpush2.bf16.msra.mxu1 %v4369_v8  ;;  %v4621_v8 = vmov 0.0  }
 0x248   :  { %3095 = vmatprep.subr.bf16.mxu1 %v4374_v54  ;;  %v4398_v54 = vld [vmem:[#allocation13 + $0x30] sm:$0xff]  }
 0x249   :  { %3055 = vmatpush2.bf16.msra.mxu0 %v4324_v28 }
 0x24a   :  { %3056 = vmatprep.subr.bf16.mxu0 %v4329_v33 }
 0x24b   :  { %3096 = vmatpush2.bf16.msra.mxu1 %v4372_v55  ;;  %v2696_v55 = vld [vmem:[%s4836_s6] sm:$0x3] }
 0x24c   :  { %3097 = vmatprep.subr.bf16.mxu1 %v4377_v56  ;;  %v2701_v56 = vrot.slane %v2696_v55, %v4724_v7  ;;  %v4400_v7 = vld [vmem:[#allocation13 + $0x20] sm:$0xff]  }
 0x24d   :  { %3057 = vmatpush2.bf16.msra.mxu0 %v4327_v31 }
 0x24e   :  { %3058 = vmatprep.subr.bf16.mxu0 %v4332_v36 }
 0x24f   :  { %3098 = vmatpush2.bf16.msra.mxu1 %v4375_v57  ;;  %v2705_v57 = vrot.slane %v2696_v55, %v4730_v10  ;;  %v4401_v10 = vld [vmem:[#allocation13 + $0x18] sm:$0xff]  }
 0x250   :  { %3099 = vmatprep.subr.bf16.mxu1 %v4380_v59 }
 0x251   :  { %3059 = vmatpush2.bf16.msra.mxu0 %v4330_v39 }
 0x252   :  { %3831 = vmatprep.subr.bf16.mxu0 %v4381_v17  ;;  %v4403_v17 = vld [vmem:[#allocation13 + $0x8] sm:$0xff]  }
 0x253   :  { %3100 = vmatpush2.bf16.msra.mxu1 %v4378_v58 }
 0x254   :  { %v2412_v30 = vpop.f32.mrf.mxu0  ;;  %3862 = vmatprep.subr.bf16.mxu1 %v4621_v8 }
 0x255   :  { %v2413_v43 = vadd.f32 %v2412_v30, %v2372_v41  ;;  %v2453_v44 = vpop.f32.mrf.mxu1 }
 0x256   :  { %v2414_v45 = vpop.f32.mrf.mxu0 }
 0x257   :  { %v2454_v46 = vadd.f32 %v2453_v44, %v2413_v43  ;;  %v2415_v47 = vadd.f32 %v2414_v45, %v2374_v16  ;;  %v2455_v48 = vpop.f32.mrf.mxu1  ;;  %v4388_v45 = vld [vmem:[#allocation11 + $0x20] sm:$0xff]  }
 0x258   :  { %v2416_v49 = vpop.f32.mrf.mxu0 }
 0x259   :  { %v2456_v50 = vadd.f32 %v2455_v48, %v2415_v47  ;;  %v2457_v32 = vpop.f32.mrf.mxu1  ;;  %4421 = vtanh.f32 %v2454_v46  ;;  %v4389_v48 = vld [vmem:[#allocation11 + $0x58] sm:$0xff]  }
 0x25a   :  { %v2417_v35 = vpop.f32.mrf.mxu0  ;;  %v4390_v49 = vld [vmem:[#allocation11 + $0x18] sm:$0xff]   ;;  %v4393_v32 = vld [vmem:[#allocation11 + $0x48] sm:$0xff]  }
 0x25b   :  { %4423 = vtanh.f32 %v2456_v50  ;;  %v2458_v52 = vpop.f32.mrf.mxu1  ;;  %v4392_v50 = vld [vmem:[#allocation11 + $0x10] sm:$0xff]   ;;  %v4395_v35 = vld [vmem:[#allocation11 + $0x40] sm:$0xff]  }
 0x25c   :  { %v4396_v52 = vld [vmem:[#allocation11] sm:$0xff]  }
 0x266   :  { %v4422_v53 = vpop.eup %4421 }
 0x267   :  { %v2628_v62 = vpack.c.bf16 %v4422_v53, %v4422_v53 }
 0x268   :  { %v4424_v60 = vpop.eup %4423 }
 0x269   :  { %v2629_v61 = vpack.c.bf16 %v4424_v60, %v4424_v60 }
 0x26b   :  { %3060 = vmatprep.mubr.bf16.mxu0 %v2629_v61 }
 0x26c   :  { %3061 = vmatmul.mubr.bf16.vlgmr.msra.gmra.mxu0 %v2628_v62 }
 0x26d   :  { %3832 = vmatpush3.bf16.msra.mxu0 %v4382_v18  ;;  %v4404_v18 = vld [vmem:[#allocation13] sm:$0xff]  }
 0x26e   :  { %3833 = vmatprep.subr.bf16.mxu0 %v4383_v19 }
 0x271   :  { %3834 = vmatpush3.bf16.msra.mxu0 %v4384_v20  ;;  %v3805_v20 = vld [vmem:[%s4838_s8] ss:$0 sm:$0xff]  ;;  %s4575_s8 = scalar_lea.vmem %s3410_s20, 128 }
 0x272   :  { %3835 = vmatprep.subr.bf16.mxu0 %v4385_v21  ;;  %p4576_p7 = scmp.ne.s32.totalorder %s3410_s20, %s4575_s8  ;;  %p4581_p9 = scmp.lt.s32.totalorder %s4575_s8, %s4575_s8 }
 0x274   :  { %p4582_p10 = por %p4581_p9, %p4580_p8 }
 0x275   :  { %3836 = vmatpush3.bf16.msra.mxu0 %v4386_v12 }
 0x276   :  { %3837 = vmatprep.subr.bf16.mxu0 %v4387_v14  ;;  %p4583_p11 = pnand %p4582_p10, %p4576_p7 }
 0x279   :  { %3838 = vmatpush3.bf16.msra.mxu0 %v4388_v45 }
 0x27a   :  { %3839 = vmatprep.subr.bf16.mxu0 %v4389_v48 }
 0x27d   :  { %3840 = vmatpush3.bf16.msra.mxu0 %v4390_v49 }
 0x27e   :  { %3841 = vmatprep.subr.bf16.mxu0 %v4391_v38 }
 0x281   :  { %3842 = vmatpush3.bf16.msra.mxu0 %v4392_v50 }
 0x282   :  { %3843 = vmatprep.subr.bf16.mxu0 %v4393_v32 }
 0x285   :  { %3844 = vmatpush3.bf16.msra.mxu0 %v4394_v51 }
 0x286   :  { %3845 = vmatprep.subr.bf16.mxu0 %v4395_v35 }
 0x289   :  { %3846 = vmatpush3.bf16.msra.mxu0 %v4396_v52 }
 0x294   :  { %v2494_v63 = vpop.f32.mrf.mxu0 }
 0x295   :  { %v2535_v1 = vpop.f32.mrf.mxu1  ;;  %v2495_v24 = vadd.f32 %v2494_v63, %v1007_v22 }
 0x296   :  { %v2496_v2 = vpop.f32.mrf.mxu0 }
 0x297   :  { %v2537_v3 = vpop.f32.mrf.mxu1  ;;  %v2497_v25 = vadd.f32 %v2496_v2, %v1011_v23  ;;  %v2536_v26 = vadd.f32 %v2535_v1, %v2495_v24 }
 0x298   :  { %v2498_v4 = vpop.f32.mrf.mxu0 }
 0x299   :  { %v2539_v5 = vpop.f32.mrf.mxu1  ;;  %v2538_v33 = vadd.f32 %v2537_v3, %v2497_v25 }
 0x29a   :  { %v2499_v13 = vpop.f32.mrf.mxu0 }
 0x29b   :  { %v2540_v15 = vpop.f32.mrf.mxu1  ;;  %v4399_v13 = vld [vmem:[#allocation13 + $0x28] sm:$0xff]  }
 0x29c   :  { %v4402_v15 = vld [vmem:[#allocation13 + $0x10] sm:$0xff]  }
 0x2d4   :  { %v2576_v28 = vpop.f32.mrf.mxu0 }
 0x2d5   :  { %v2577_v31 = vadd.f32 %v2576_v28, %v2536_v26  ;;  %v2617_v36 = vpop.f32.mrf.mxu1  ;;  %v3822_v28 = vld [vmem:[%s4840_s10] ss:$0 sm:$0xff] }
 0x2d6   :  { %v2578_v34 = vpop.f32.mrf.mxu0 }
 0x2d7   :  { %v2618_v37 = vadd.f32 %v2617_v36, %v2577_v31  ;;  %v2579_v39 = vadd.f32 %v2578_v34, %v2538_v33  ;;  %v2619_v40 = vpop.f32.mrf.mxu1 }
 0x2d8   :  { %v2580_v0 = vpop.f32.mrf.mxu0 }
 0x2d9   :  { %v2620_v41 = vadd.f32 %v2619_v40, %v2579_v39  ;;  %v2621_v30 = vpop.f32.mrf.mxu1  ;;  %4425 = vtanh.f32 %v2618_v37 }
 0x2da   :  { %v2581_v9 = vpop.f32.mrf.mxu0 }
 0x2db   :  { %4427 = vtanh.f32 %v2620_v41  ;;  %v2622_v6 = vpop.f32.mrf.mxu1 }
 0x2e6   :  { %v4426_v42 = vpop.eup %4425 }
 0x2e7   :  { %v2630_v16 = vpack.c.bf16 %v4426_v42, %v4426_v42 }
 0x2e8   :  { %v4428_v11 = vpop.eup %4427 }
 0x2e9   :  { %v2631_v29 = vpack.c.bf16 %v4428_v11, %v4428_v11 }
 0x2eb   :  { %3101 = vmatprep.mubr.bf16.mxu1 %v2631_v29 }
 0x2ec   :  { %3102 = vmatmul.mubr.bf16.vlgmr.msra.gmra.mxu1 %v2630_v16 }
 0x2ed   :  { %3863 = vmatpush3.bf16.msra.mxu1 %v4397_v27  ;;  %3878 = vmatprep.mubr.msk.bf16.mxu1 %vm4622_vm0, %v4621_v8 }
 0x2ee   :  { %3864 = vmatprep.subr.bf16.mxu1 %v4621_v8 }
 0x2f1   :  { %3865 = vmatpush3.bf16.msra.mxu1 %v4398_v54 }
 0x2f2   :  { %3866 = vmatprep.subr.bf16.mxu1 %v4621_v8 }
 0x2f5   :  { %3867 = vmatpush3.bf16.msra.mxu1 %v4399_v13 }
 0x2f6   :  { %3868 = vmatprep.subr.bf16.mxu1 %v4621_v8 }
 0x2f9   :  { %3869 = vmatpush3.bf16.msra.mxu1 %v4400_v7 }
 0x2fa   :  { %3870 = vmatprep.subr.bf16.mxu1 %v4621_v8 }
 0x2fd   :  { %3871 = vmatpush3.bf16.msra.mxu1 %v4401_v10 }
 0x2fe   :  { %3872 = vmatprep.subr.bf16.mxu1 %v4621_v8 }
 0x301   :  { %3873 = vmatpush3.bf16.msra.mxu1 %v4402_v15 }
 0x302   :  { %3874 = vmatprep.subr.bf16.mxu1 %v4621_v8 }
 0x305   :  { %3875 = vmatpush3.bf16.msra.mxu1 %v4403_v17 }
 0x306   :  { %3876 = vmatprep.subr.bf16.mxu1 %v4621_v8 }
 0x309   :  { %3877 = vmatpush3.bf16.msra.mxu1 %v4404_v18 }
 0x32c   :  { %v3062_v43 = vpop.f32.mrf.mxu0 }
 0x32d   :  { %v3063_v53 = vadd.f32 %v3062_v43, %v2701_v56 }
 0x32e   :  { %v3064_v44 = vpop.f32.mrf.mxu0 }
 0x32f   :  { %v3065_v59 = vadd.f32 %v3064_v44, %v2705_v57 }
 0x330   :  { %v3066_v46 = vpop.f32.mrf.mxu0 }
 0x332   :  { %v3067_v47 = vpop.f32.mrf.mxu0 }
 0x3ac   :  { %v3103_v58 = vpop.f32.mrf.mxu1 }
 0x3ad   :  { %v3104_v60 = vadd.f32 %v3103_v58, %v3063_v53 }
 0x3ae   :  { %v3105_v61 = vpop.f32.mrf.mxu1 }
 0x3af   :  { %v3106_v62 = vadd.f32 %v3105_v61, %v3065_v59  ;;  %4429 = vtanh.f32 %v3104_v60 }
 0x3b0   :  { %v3107_v63 = vpop.f32.mrf.mxu1 }
 0x3b1   :  { %4431 = vtanh.f32 %v3106_v62 }
 0x3b2   :  { %v3108_v1 = vpop.f32.mrf.mxu1 }
 0x3bc   :  { %v4430_v2 = vpop.eup %4429 }
 0x3bd   :  { %v3112_v5 = vpack.c.bf16 %v4430_v2, %v4430_v2 }
 0x3be   :  { %v4432_v3 = vpop.eup %4431 }
 0x3bf   :  { %v3113_v4 = vpack.c.bf16 %v4432_v3, %v4432_v3 }
 0x3c1   :  { %3281 = vmatprep.mubr.bf16.mxu0 %v3113_v4 }
 0x3c2   :  { %3282 = vmatmul.mubr.bf16.vlgmr.msra.gmra.mxu0 %v3112_v5 }
 0x482   :  { %v3847_v19 = vpop.f32.mrf.mxu0 }
 0x484   :  { %v3848_v21 = vpop.f32.mrf.mxu0 }
 0x485   :  { %v3849_v12 = vadd.f32 %v3848_v21, %v3847_v19 }
 0x486   :  { %v3850_v22 = vpop.f32.mrf.mxu0 }
 0x487   :  { %v3284_v23 = vadd.f32 %v3849_v12, %v3805_v20 }
 0x488   :  { %v3851_v24 = vpop.f32.mrf.mxu0 }
 0x489   :  { %4433 = vtanh.f32 %v3284_v23 }
 0x496   :  { %v4434_v25 = vpop.eup %4433 }
 0x497   :  { %v3290_v26 = vpack.c.bf16 %v4434_v25, %v4434_v25 }
 0x499   :  { %3879 = vmatmul.mubr.bf16.vlgmr.msra.gmra.mxu1 %v3290_v26 }
 0x559   :  { %v3396_v33 = vpop.f32.mrf.mxu1 }
 0x55a   :  { %v3397_v31 = vadd.f32 %v3822_v28, %v3396_v33 }
 0x55b   :  { %v3880_v36 = vpop.f32.mrf.mxu1 }
 0x55c   :  { %3402 = vst [vmem:[#allocation14] sm:$0xff] %v3397_v31 }
 0x55d   :  { %v3399_v34 = vpop.f32.mrf.mxu1 }
 0x55e   :  { %4586 = shalt.err (!%p4583_p11)
}
 0x55f   :  { %3412 = dma.vmem_to_hbm [thread:$0]  %s3410_s20, 128, %s4841_s11, [#allocation4]   ;;  %v3881_v37 = vpop.f32.mrf.mxu1 }
 0x560   :  { %4603 = dma.done.wait [#allocation4], 128  }
 0x561   :  { %4604 = vsyncadd [#allocation4], 4294967168 }
 0x562   :  { %3416 = vsyncpa [#allocation3], 1 }
 0x563   :  { %3417 = vsyncpa [#allocation6], 1 }
 0x564   :  { %3418 = vsyncpa [#allocation9], 1 }
 0x565   :  { %3419 = vsyncpa [#allocation12], 1 }
 0x566   :  { %3420 = vsyncpa [#allocation4], 1 }

</bundles_post_ra>
